<compile_context>
chip_gen: v5e
topology: v5e:2x2
jax: 0.10.0
libtpu: 0.0.40
codegen_flags: <defaults>
</compile_context>

<pallas_src>
import jax
import jax.numpy as jnp
from jax import lax
from jax.experimental import pallas as pl
from jax.experimental.pallas import tpu as pltpu


def _make_skipgram_kernel(tb: int, cast_to_mxu: bool, mxu_dtype):
    """Build the kernel body for a given batch tile / MXU-dtype configuration."""

    unroll_gather = tb <= 64  # short, fixed trip count -> static unroll

    def kernel(x_smem, w_hbm, w_slab_ref, o_ref, emb_f32_ref, *rest):
        # x_smem      : [B_pad] int32, SMEM (scalar-prefetched word indices)
        # w_hbm       : [V, E] f32, raw HBM ref (gather source; never whole in VMEM)
        # w_slab_ref  : [tv, E] mxu-dtype VMEM slab of the tied projection weight
        # o_ref       : [tb, tv] f32 output logits tile
        # emb_f32_ref : [tb, E] f32 VMEM scratch (gathered embeddings)
        # rest        : ([tb, E] mxu-dtype scratch if casting,) DMA sems [tb]
        if cast_to_mxu:
            emb_mxu_ref, sem = rest
        else:
            (sem,) = rest
            emb_mxu_ref = emb_f32_ref

        i = pl.program_id(0)  # batch tile
        j = pl.program_id(1)  # vocab tile

        # Gather W[x] once per batch tile (first vocab tile only); the scratch
        # is then reused across the whole vocab axis.
        @pl.when(j == 0)
        def _gather():
            def issue(r):
                idx = x_smem[i * tb + r]
                pltpu.make_async_copy(
                    w_hbm.at[pl.ds(idx, 1), :],
                    emb_f32_ref.at[pl.ds(r, 1), :],
                    sem.at[r],
                ).start()

            def finish(r):
                # Only shape + semaphore matter for the wait descriptor.
                pltpu.make_async_copy(
                    w_hbm.at[pl.ds(0, 1), :],
                    emb_f32_ref.at[pl.ds(r, 1), :],
                    sem.at[r],
                ).wait()

            if unroll_gather:
                for r in range(tb):       # static unroll: static dst/sem addresses
                    issue(r)
                for r in range(tb):
                    finish(r)
            else:
                lax.fori_loop(0, tb, lambda r, c: (issue(r), c)[1], 0)
                lax.fori_loop(0, tb, lambda r, c: (finish(r), c)[1], 0)

            if cast_to_mxu:
                # Cast once per batch tile instead of once per vocab tile.
                emb_mxu_ref[...] = emb_f32_ref[...].astype(mxu_dtype)

        # Tied projection on the MXU: [tb, E] x [tv, E]^T -> [tb, tv], f32 accum.
        logits = lax.dot_general(
            emb_mxu_ref[...],
            w_slab_ref[...],
            dimension_numbers=(((1,), (1,)), ((), ())),
            preferred_element_type=jnp.float32,
        )
        o_ref[...] = logits.astype(o_ref.dtype)

    return kernel


def skipgram_forward(x, w, *, tb=None, tv=None, mxu_dtype=jnp.bfloat16):
    """x: [B] int indices, w: [V, E] f32 tied weights -> [B, V] f32 logits."""
    B = x.shape[0]
    V, E = w.shape

    # Batch tile: whole (8-aligned) batch for tiny batches, capped at 256.
    if tb is None:
        tb = min(pl.cdiv(B, 8) * 8, 256)
    assert tb % 8 == 0, "batch tile must be a multiple of 8 sublanes"
    B_pad = pl.cdiv(B, tb) * tb

    # Vocab tile: largest lane-dense (multiple-of-128) divisor up to 512,
    # else the full vocab (full-extent blocks are always legal).
    if tv is None:
        tv = V
        for cand in (512, 256, 128):
            if V % cand == 0:
                tv = cand
                break
    assert V % tv == 0, "vocab must be divisible by the vocab tile"

    x_pad = jnp.zeros((B_pad,), dtype=jnp.int32).at[:B].set(x.astype(jnp.int32))

    cast_to_mxu = jnp.dtype(mxu_dtype) != jnp.dtype(jnp.float32)
    # bf16 stream for the MXU slabs (f32 accumulation inside the kernel);
    # also halves their HBM traffic.  mxu_dtype=f32 keeps bit-closeness to
    # the PyTorch f32 reference.
    w_proj = w.astype(mxu_dtype) if cast_to_mxu else w

    scratch_shapes = [pltpu.VMEM((tb, E), jnp.float32)]      # gathered embeddings (f32)
    if cast_to_mxu:
        scratch_shapes.append(pltpu.VMEM((tb, E), mxu_dtype))  # MXU-dtype copy
    scratch_shapes.append(pltpu.SemaphoreType.DMA((tb,)))      # one sem per gathered row

    kernel = _make_skipgram_kernel(tb, cast_to_mxu, mxu_dtype)

    grid = (B_pad // tb, V // tv)
    out = pl.pallas_call(
        kernel,
        out_shape=jax.ShapeDtypeStruct((B_pad, V), jnp.float32),
        grid_spec=pltpu.PrefetchScalarGridSpec(
            num_scalar_prefetch=1,                             # x -> SMEM
            grid=grid,
            in_specs=[
                pl.BlockSpec(memory_space=pl.ANY),             # full W stays in HBM (row gather)
                pl.BlockSpec((tv, E), lambda i, j, xs: (j, 0)),  # streamed projection slab
            ],
            out_specs=pl.BlockSpec((tb, tv), lambda i, j, xs: (i, j)),
            scratch_shapes=scratch_shapes,
        ),
        compiler_params=pltpu.CompilerParams(
            dimension_semantics=("parallel", "arbitrary"),
            vmem_limit_bytes=32 * 1024 * 1024,
        ),
    )(x_pad, w, w_proj)
    return out[:B]


if __name__ == "__main__":
    # Small, TPU-friendly shapes consistent with the module:
    num_words = 256   # V
    embed_dim = 128   # E
    batch = 16        # B

    key = jax.random.PRNGKey(0)
    k_w, k_x = jax.random.split(key)

    # Deterministic init mirroring nn.Embedding default (N(0, 1)).
    w = jax.random.normal(k_w, (num_words, embed_dim), dtype=jnp.float32)
    x = jax.random.randint(k_x, (batch,), 0, num_words, dtype=jnp.int32)

    # Pure-JAX reference: W[x] @ W.T
    ref = jnp.take(w, x, axis=0) @ w.T

    # f32 MXU path (bit-close to the PyTorch f32 reference); tv=128 exercises
    # the vocab-tiled grid and the gather-once / reuse path.
    out_f32 = jax.block_until_ready(
        skipgram_forward(x, w, tv=128, mxu_dtype=jnp.float32)
    )
    assert out_f32.shape == (batch, num_words)
    assert jnp.allclose(out_f32, ref, atol=1e-4, rtol=1e-4), "f32 mismatch vs reference"

    # bf16-input / f32-accumulate MXU fast path (default; looser numerics).
    out_bf16 = jax.block_until_ready(
        skipgram_forward(x, w, tv=128, mxu_dtype=jnp.bfloat16)
    )
    assert out_bf16.shape == (batch, num_words)
    assert jnp.allclose(out_bf16, ref, atol=1.0, rtol=3e-2), "bf16 mismatch vs reference"

    print("KERNEL_OK")
</pallas_src>

<mosaic_0001>
module attributes {stable_mosaic.version = 11 : i64} {
  func.func @kernel(%arg0: i32, %arg1: i32, %arg2: memref<16xi32, #tpu.memory_space<smem>>, %arg3: memref<256x128xf32, #tpu.memory_space<any>>, %arg4: memref<128x128xf32, #tpu.memory_space<vmem>>, %arg5: memref<16x128xf32, #tpu.memory_space<vmem>>, %arg6: memref<16x128xf32, #tpu.memory_space<vmem>>, %arg7: memref<16x!tpu.dma_semaphore, #tpu.memory_space<semaphore_mem>>) attributes {dimension_semantics = [#tpu.dimension_semantics<parallel>, #tpu.dimension_semantics<arbitrary>], iteration_bounds = array<i64: 1, 2>, scalar_prefetch = 1 : i64, scratch_operands = 2 : i64, tpu.core_type = #tpu.core_type<tc>, window_params = [{}, {transform_indices = @transform_1, window_bounds = array<i64: 128, 128>}, {transform_indices = @transform_2, window_bounds = array<i64: 16, 128>}]} {
    %c0_i32 = arith.constant 0 : i32
    %0 = arith.cmpi eq, %arg1, %c0_i32 : i32
    %1 = arith.extui %0 : i1 to i32
    %c0_i32_0 = arith.constant 0 : i32
    %2 = arith.cmpi ne, %1, %c0_i32_0 : i32
    scf.if %2 {
      %c16_i32 = arith.constant 16 : i32
      %7 = arith.muli %arg0, %c16_i32 : i32
      %c0_i32_6 = arith.constant 0 : i32
      %8 = arith.addi %7, %c0_i32_6 : i32
      %9 = arith.index_cast %8 : i32 to index
      %10 = memref.load %arg2[%9] : memref<16xi32, #tpu.memory_space<smem>>
      %c0_i32_7 = arith.constant 0 : i32
      %c0_i32_8 = arith.constant 0 : i32
      %11 = tpu.memref_slice %arg3[%10, %c0_i32_8] : memref<256x128xf32, #tpu.memory_space<any>> -> memref<1x128xf32, #tpu.memory_space<any>>
      %c0_i32_9 = arith.constant 0 : i32
      %c0_i32_10 = arith.constant 0 : i32
      %12 = tpu.memref_slice %arg6[%c0_i32_9, %c0_i32_10] : memref<16x128xf32, #tpu.memory_space<vmem>> -> memref<1x128xf32, #tpu.memory_space<vmem>>
      %13 = tpu.memref_slice %arg7[%c0_i32_7] : memref<16x!tpu.dma_semaphore, #tpu.memory_space<semaphore_mem>> -> memref<1x!tpu.dma_semaphore, #tpu.memory_space<semaphore_mem>>
      %14 = tpu.memref_squeeze %13 : memref<1x!tpu.dma_semaphore, #tpu.memory_space<semaphore_mem>> -> memref<!tpu.dma_semaphore, #tpu.memory_space<semaphore_mem>>
      tpu.enqueue_dma source(%11 : memref<1x128xf32, #tpu.memory_space<any>>) target(%12 : memref<1x128xf32, #tpu.memory_space<vmem>>) target_semaphore(%14 : memref<!tpu.dma_semaphore, #tpu.memory_space<semaphore_mem>>)
      %c16_i32_11 = arith.constant 16 : i32
      %15 = arith.muli %arg0, %c16_i32_11 : i32
      %c1_i32 = arith.constant 1 : i32
      %16 = arith.addi %15, %c1_i32 : i32
      %17 = arith.index_cast %16 : i32 to index
      %18 = memref.load %arg2[%17] : memref<16xi32, #tpu.memory_space<smem>>
      %c1_i32_12 = arith.constant 1 : i32
      %c0_i32_13 = arith.constant 0 : i32
      %19 = tpu.memref_slice %arg3[%18, %c0_i32_13] : memref<256x128xf32, #tpu.memory_space<any>> -> memref<1x128xf32, #tpu.memory_space<any>>
      %c1_i32_14 = arith.constant 1 : i32
      %c0_i32_15 = arith.constant 0 : i32
      %20 = tpu.memref_slice %arg6[%c1_i32_14, %c0_i32_15] : memref<16x128xf32, #tpu.memory_space<vmem>> -> memref<1x128xf32, #tpu.memory_space<vmem>>
      %21 = tpu.memref_slice %arg7[%c1_i32_12] : memref<16x!tpu.dma_semaphore, #tpu.memory_space<semaphore_mem>> -> memref<1x!tpu.dma_semaphore, #tpu.memory_space<semaphore_mem>>
      %22 = tpu.memref_squeeze %21 : memref<1x!tpu.dma_semaphore, #tpu.memory_space<semaphore_mem>> -> memref<!tpu.dma_semaphore, #tpu.memory_space<semaphore_mem>>
      tpu.enqueue_dma source(%19 : memref<1x128xf32, #tpu.memory_space<any>>) target(%20 : memref<1x128xf32, #tpu.memory_space<vmem>>) target_semaphore(%22 : memref<!tpu.dma_semaphore, #tpu.memory_space<semaphore_mem>>)
      %c16_i32_16 = arith.constant 16 : i32
      %23 = arith.muli %arg0, %c16_i32_16 : i32
      %c2_i32 = arith.constant 2 : i32
      %24 = arith.addi %23, %c2_i32 : i32
      %25 = arith.index_cast %24 : i32 to index
      %26 = memref.load %arg2[%25] : memref<16xi32, #tpu.memory_space<smem>>
      %c2_i32_17 = arith.constant 2 : i32
      %c0_i32_18 = arith.constant 0 : i32
      %27 = tpu.memref_slice %arg3[%26, %c0_i32_18] : memref<256x128xf32, #tpu.memory_space<any>> -> memref<1x128xf32, #tpu.memory_space<any>>
      %c2_i32_19 = arith.constant 2 : i32
      %c0_i32_20 = arith.constant 0 : i32
      %28 = tpu.memref_slice %arg6[%c2_i32_19, %c0_i32_20] : memref<16x128xf32, #tpu.memory_space<vmem>> -> memref<1x128xf32, #tpu.memory_space<vmem>>
      %29 = tpu.memref_slice %arg7[%c2_i32_17] : memref<16x!tpu.dma_semaphore, #tpu.memory_space<semaphore_mem>> -> memref<1x!tpu.dma_semaphore, #tpu.memory_space<semaphore_mem>>
      %30 = tpu.memref_squeeze %29 : memref<1x!tpu.dma_semaphore, #tpu.memory_space<semaphore_mem>> -> memref<!tpu.dma_semaphore, #tpu.memory_space<semaphore_mem>>
      tpu.enqueue_dma source(%27 : memref<1x128xf32, #tpu.memory_space<any>>) target(%28 : memref<1x128xf32, #tpu.memory_space<vmem>>) target_semaphore(%30 : memref<!tpu.dma_semaphore, #tpu.memory_space<semaphore_mem>>)
      %c16_i32_21 = arith.constant 16 : i32
      %31 = arith.muli %arg0, %c16_i32_21 : i32
      %c3_i32 = arith.constant 3 : i32
      %32 = arith.addi %31, %c3_i32 : i32
      %33 = arith.index_cast %32 : i32 to index
      %34 = memref.load %arg2[%33] : memref<16xi32, #tpu.memory_space<smem>>
      %c3_i32_22 = arith.constant 3 : i32
      %c0_i32_23 = arith.constant 0 : i32
      %35 = tpu.memref_slice %arg3[%34, %c0_i32_23] : memref<256x128xf32, #tpu.memory_space<any>> -> memref<1x128xf32, #tpu.memory_space<any>>
      %c3_i32_24 = arith.constant 3 : i32
      %c0_i32_25 = arith.constant 0 : i32
      %36 = tpu.memref_slice %arg6[%c3_i32_24, %c0_i32_25] : memref<16x128xf32, #tpu.memory_space<vmem>> -> memref<1x128xf32, #tpu.memory_space<vmem>>
      %37 = tpu.memref_slice %arg7[%c3_i32_22] : memref<16x!tpu.dma_semaphore, #tpu.memory_space<semaphore_mem>> -> memref<1x!tpu.dma_semaphore, #tpu.memory_space<semaphore_mem>>
      %38 = tpu.memref_squeeze %37 : memref<1x!tpu.dma_semaphore, #tpu.memory_space<semaphore_mem>> -> memref<!tpu.dma_semaphore, #tpu.memory_space<semaphore_mem>>
      tpu.enqueue_dma source(%35 : memref<1x128xf32, #tpu.memory_space<any>>) target(%36 : memref<1x128xf32, #tpu.memory_space<vmem>>) target_semaphore(%38 : memref<!tpu.dma_semaphore, #tpu.memory_space<semaphore_mem>>)
      %c16_i32_26 = arith.constant 16 : i32
      %39 = arith.muli %arg0, %c16_i32_26 : i32
      %c4_i32 = arith.constant 4 : i32
      %40 = arith.addi %39, %c4_i32 : i32
      %41 = arith.index_cast %40 : i32 to index
      %42 = memref.load %arg2[%41] : memref<16xi32, #tpu.memory_space<smem>>
      %c4_i32_27 = arith.constant 4 : i32
      %c0_i32_28 = arith.constant 0 : i32
      %43 = tpu.memref_slice %arg3[%42, %c0_i32_28] : memref<256x128xf32, #tpu.memory_space<any>> -> memref<1x128xf32, #tpu.memory_space<any>>
      %c4_i32_29 = arith.constant 4 : i32
      %c0_i32_30 = arith.constant 0 : i32
      %44 = tpu.memref_slice %arg6[%c4_i32_29, %c0_i32_30] : memref<16x128xf32, #tpu.memory_space<vmem>> -> memref<1x128xf32, #tpu.memory_space<vmem>>
      %45 = tpu.memref_slice %arg7[%c4_i32_27] : memref<16x!tpu.dma_semaphore, #tpu.memory_space<semaphore_mem>> -> memref<1x!tpu.dma_semaphore, #tpu.memory_space<semaphore_mem>>
      %46 = tpu.memref_squeeze %45 : memref<1x!tpu.dma_semaphore, #tpu.memory_space<semaphore_mem>> -> memref<!tpu.dma_semaphore, #tpu.memory_space<semaphore_mem>>
      tpu.enqueue_dma source(%43 : memref<1x128xf32, #tpu.memory_space<any>>) target(%44 : memref<1x128xf32, #tpu.memory_space<vmem>>) target_semaphore(%46 : memref<!tpu.dma_semaphore, #tpu.memory_space<semaphore_mem>>)
      %c16_i32_31 = arith.constant 16 : i32
      %47 = arith.muli %arg0, %c16_i32_31 : i32
      %c5_i32 = arith.constant 5 : i32
      %48 = arith.addi %47, %c5_i32 : i32
      %49 = arith.index_cast %48 : i32 to index
      %50 = memref.load %arg2[%49] : memref<16xi32, #tpu.memory_space<smem>>
      %c5_i32_32 = arith.constant 5 : i32
      %c0_i32_33 = arith.constant 0 : i32
      %51 = tpu.memref_slice %arg3[%50, %c0_i32_33] : memref<256x128xf32, #tpu.memory_space<any>> -> memref<1x128xf32, #tpu.memory_space<any>>
      %c5_i32_34 = arith.constant 5 : i32
      %c0_i32_35 = arith.constant 0 : i32
      %52 = tpu.memref_slice %arg6[%c5_i32_34, %c0_i32_35] : memref<16x128xf32, #tpu.memory_space<vmem>> -> memref<1x128xf32, #tpu.memory_space<vmem>>
      %53 = tpu.memref_slice %arg7[%c5_i32_32] : memref<16x!tpu.dma_semaphore, #tpu.memory_space<semaphore_mem>> -> memref<1x!tpu.dma_semaphore, #tpu.memory_space<semaphore_mem>>
      %54 = tpu.memref_squeeze %53 : memref<1x!tpu.dma_semaphore, #tpu.memory_space<semaphore_mem>> -> memref<!tpu.dma_semaphore, #tpu.memory_space<semaphore_mem>>
      tpu.enqueue_dma source(%51 : memref<1x128xf32, #tpu.memory_space<any>>) target(%52 : memref<1x128xf32, #tpu.memory_space<vmem>>) target_semaphore(%54 : memref<!tpu.dma_semaphore, #tpu.memory_space<semaphore_mem>>)
      %c16_i32_36 = arith.constant 16 : i32
      %55 = arith.muli %arg0, %c16_i32_36 : i32
      %c6_i32 = arith.constant 6 : i32
      %56 = arith.addi %55, %c6_i32 : i32
      %57 = arith.index_cast %56 : i32 to index
      %58 = memref.load %arg2[%57] : memref<16xi32, #tpu.memory_space<smem>>
      %c6_i32_37 = arith.constant 6 : i32
      %c0_i32_38 = arith.constant 0 : i32
      %59 = tpu.memref_slice %arg3[%58, %c0_i32_38] : memref<256x128xf32, #tpu.memory_space<any>> -> memref<1x128xf32, #tpu.memory_space<any>>
      %c6_i32_39 = arith.constant 6 : i32
      %c0_i32_40 = arith.constant 0 : i32
      %60 = tpu.memref_slice %arg6[%c6_i32_39, %c0_i32_40] : memref<16x128xf32, #tpu.memory_space<vmem>> -> memref<1x128xf32, #tpu.memory_space<vmem>>
      %61 = tpu.memref_slice %arg7[%c6_i32_37] : memref<16x!tpu.dma_semaphore, #tpu.memory_space<semaphore_mem>> -> memref<1x!tpu.dma_semaphore, #tpu.memory_space<semaphore_mem>>
      %62 = tpu.memref_squeeze %61 : memref<1x!tpu.dma_semaphore, #tpu.memory_space<semaphore_mem>> -> memref<!tpu.dma_semaphore, #tpu.memory_space<semaphore_mem>>
      tpu.enqueue_dma source(%59 : memref<1x128xf32, #tpu.memory_space<any>>) target(%60 : memref<1x128xf32, #tpu.memory_space<vmem>>) target_semaphore(%62 : memref<!tpu.dma_semaphore, #tpu.memory_space<semaphore_mem>>)
      %c16_i32_41 = arith.constant 16 : i32
      %63 = arith.muli %arg0, %c16_i32_41 : i32
      %c7_i32 = arith.constant 7 : i32
      %64 = arith.addi %63, %c7_i32 : i32
      %65 = arith.index_cast %64 : i32 to index
      %66 = memref.load %arg2[%65] : memref<16xi32, #tpu.memory_space<smem>>
      %c7_i32_42 = arith.constant 7 : i32
      %c0_i32_43 = arith.constant 0 : i32
      %67 = tpu.memref_slice %arg3[%66, %c0_i32_43] : memref<256x128xf32, #tpu.memory_space<any>> -> memref<1x128xf32, #tpu.memory_space<any>>
      %c7_i32_44 = arith.constant 7 : i32
      %c0_i32_45 = arith.constant 0 : i32
      %68 = tpu.memref_slice %arg6[%c7_i32_44, %c0_i32_45] : memref<16x128xf32, #tpu.memory_space<vmem>> -> memref<1x128xf32, #tpu.memory_space<vmem>>
      %69 = tpu.memref_slice %arg7[%c7_i32_42] : memref<16x!tpu.dma_semaphore, #tpu.memory_space<semaphore_mem>> -> memref<1x!tpu.dma_semaphore, #tpu.memory_space<semaphore_mem>>
      %70 = tpu.memref_squeeze %69 : memref<1x!tpu.dma_semaphore, #tpu.memory_space<semaphore_mem>> -> memref<!tpu.dma_semaphore, #tpu.memory_space<semaphore_mem>>
      tpu.enqueue_dma source(%67 : memref<1x128xf32, #tpu.memory_space<any>>) target(%68 : memref<1x128xf32, #tpu.memory_space<vmem>>) target_semaphore(%70 : memref<!tpu.dma_semaphore, #tpu.memory_space<semaphore_mem>>)
      %c16_i32_46 = arith.constant 16 : i32
      %71 = arith.muli %arg0, %c16_i32_46 : i32
      %c8_i32 = arith.constant 8 : i32
      %72 = arith.addi %71, %c8_i32 : i32
      %73 = arith.index_cast %72 : i32 to index
      %74 = memref.load %arg2[%73] : memref<16xi32, #tpu.memory_space<smem>>
      %c8_i32_47 = arith.constant 8 : i32
      %c0_i32_48 = arith.constant 0 : i32
      %75 = tpu.memref_slice %arg3[%74, %c0_i32_48] : memref<256x128xf32, #tpu.memory_space<any>> -> memref<1x128xf32, #tpu.memory_space<any>>
      %c8_i32_49 = arith.constant 8 : i32
      %c0_i32_50 = arith.constant 0 : i32
      %76 = tpu.memref_slice %arg6[%c8_i32_49, %c0_i32_50] : memref<16x128xf32, #tpu.memory_space<vmem>> -> memref<1x128xf32, #tpu.memory_space<vmem>>
      %77 = tpu.memref_slice %arg7[%c8_i32_47] : memref<16x!tpu.dma_semaphore, #tpu.memory_space<semaphore_mem>> -> memref<1x!tpu.dma_semaphore, #tpu.memory_space<semaphore_mem>>
      %78 = tpu.memref_squeeze %77 : memref<1x!tpu.dma_semaphore, #tpu.memory_space<semaphore_mem>> -> memref<!tpu.dma_semaphore, #tpu.memory_space<semaphore_mem>>
      tpu.enqueue_dma source(%75 : memref<1x128xf32, #tpu.memory_space<any>>) target(%76 : memref<1x128xf32, #tpu.memory_space<vmem>>) target_semaphore(%78 : memref<!tpu.dma_semaphore, #tpu.memory_space<semaphore_mem>>)
      %c16_i32_51 = arith.constant 16 : i32
      %79 = arith.muli %arg0, %c16_i32_51 : i32
      %c9_i32 = arith.constant 9 : i32
      %80 = arith.addi %79, %c9_i32 : i32
      %81 = arith.index_cast %80 : i32 to index
      %82 = memref.load %arg2[%81] : memref<16xi32, #tpu.memory_space<smem>>
      %c9_i32_52 = arith.constant 9 : i32
      %c0_i32_53 = arith.constant 0 : i32
      %83 = tpu.memref_slice %arg3[%82, %c0_i32_53] : memref<256x128xf32, #tpu.memory_space<any>> -> memref<1x128xf32, #tpu.memory_space<any>>
      %c9_i32_54 = arith.constant 9 : i32
      %c0_i32_55 = arith.constant 0 : i32
      %84 = tpu.memref_slice %arg6[%c9_i32_54, %c0_i32_55] : memref<16x128xf32, #tpu.memory_space<vmem>> -> memref<1x128xf32, #tpu.memory_space<vmem>>
      %85 = tpu.memref_slice %arg7[%c9_i32_52] : memref<16x!tpu.dma_semaphore, #tpu.memory_space<semaphore_mem>> -> memref<1x!tpu.dma_semaphore, #tpu.memory_space<semaphore_mem>>
      %86 = tpu.memref_squeeze %85 : memref<1x!tpu.dma_semaphore, #tpu.memory_space<semaphore_mem>> -> memref<!tpu.dma_semaphore, #tpu.memory_space<semaphore_mem>>
      tpu.enqueue_dma source(%83 : memref<1x128xf32, #tpu.memory_space<any>>) target(%84 : memref<1x128xf32, #tpu.memory_space<vmem>>) target_semaphore(%86 : memref<!tpu.dma_semaphore, #tpu.memory_space<semaphore_mem>>)
      %c16_i32_56 = arith.constant 16 : i32
      %87 = arith.muli %arg0, %c16_i32_56 : i32
      %c10_i32 = arith.constant 10 : i32
      %88 = arith.addi %87, %c10_i32 : i32
      %89 = arith.index_cast %88 : i32 to index
      %90 = memref.load %arg2[%89] : memref<16xi32, #tpu.memory_space<smem>>
      %c10_i32_57 = arith.constant 10 : i32
      %c0_i32_58 = arith.constant 0 : i32
      %91 = tpu.memref_slice %arg3[%90, %c0_i32_58] : memref<256x128xf32, #tpu.memory_space<any>> -> memref<1x128xf32, #tpu.memory_space<any>>
      %c10_i32_59 = arith.constant 10 : i32
      %c0_i32_60 = arith.constant 0 : i32
      %92 = tpu.memref_slice %arg6[%c10_i32_59, %c0_i32_60] : memref<16x128xf32, #tpu.memory_space<vmem>> -> memref<1x128xf32, #tpu.memory_space<vmem>>
      %93 = tpu.memref_slice %arg7[%c10_i32_57] : memref<16x!tpu.dma_semaphore, #tpu.memory_space<semaphore_mem>> -> memref<1x!tpu.dma_semaphore, #tpu.memory_space<semaphore_mem>>
      %94 = tpu.memref_squeeze %93 : memref<1x!tpu.dma_semaphore, #tpu.memory_space<semaphore_mem>> -> memref<!tpu.dma_semaphore, #tpu.memory_space<semaphore_mem>>
      tpu.enqueue_dma source(%91 : memref<1x128xf32, #tpu.memory_space<any>>) target(%92 : memref<1x128xf32, #tpu.memory_space<vmem>>) target_semaphore(%94 : memref<!tpu.dma_semaphore, #tpu.memory_space<semaphore_mem>>)
      %c16_i32_61 = arith.constant 16 : i32
      %95 = arith.muli %arg0, %c16_i32_61 : i32
      %c11_i32 = arith.constant 11 : i32
      %96 = arith.addi %95, %c11_i32 : i32
      %97 = arith.index_cast %96 : i32 to index
      %98 = memref.load %arg2[%97] : memref<16xi32, #tpu.memory_space<smem>>
      %c11_i32_62 = arith.constant 11 : i32
      %c0_i32_63 = arith.constant 0 : i32
      %99 = tpu.memref_slice %arg3[%98, %c0_i32_63] : memref<256x128xf32, #tpu.memory_space<any>> -> memref<1x128xf32, #tpu.memory_space<any>>
      %c11_i32_64 = arith.constant 11 : i32
      %c0_i32_65 = arith.constant 0 : i32
      %100 = tpu.memref_slice %arg6[%c11_i32_64, %c0_i32_65] : memref<16x128xf32, #tpu.memory_space<vmem>> -> memref<1x128xf32, #tpu.memory_space<vmem>>
      %101 = tpu.memref_slice %arg7[%c11_i32_62] : memref<16x!tpu.dma_semaphore, #tpu.memory_space<semaphore_mem>> -> memref<1x!tpu.dma_semaphore, #tpu.memory_space<semaphore_mem>>
      %102 = tpu.memref_squeeze %101 : memref<1x!tpu.dma_semaphore, #tpu.memory_space<semaphore_mem>> -> memref<!tpu.dma_semaphore, #tpu.memory_space<semaphore_mem>>
      tpu.enqueue_dma source(%99 : memref<1x128xf32, #tpu.memory_space<any>>) target(%100 : memref<1x128xf32, #tpu.memory_space<vmem>>) target_semaphore(%102 : memref<!tpu.dma_semaphore, #tpu.memory_space<semaphore_mem>>)
      %c16_i32_66 = arith.constant 16 : i32
      %103 = arith.muli %arg0, %c16_i32_66 : i32
      %c12_i32 = arith.constant 12 : i32
      %104 = arith.addi %103, %c12_i32 : i32
      %105 = arith.index_cast %104 : i32 to index
      %106 = memref.load %arg2[%105] : memref<16xi32, #tpu.memory_space<smem>>
      %c12_i32_67 = arith.constant 12 : i32
      %c0_i32_68 = arith.constant 0 : i32
      %107 = tpu.memref_slice %arg3[%106, %c0_i32_68] : memref<256x128xf32, #tpu.memory_space<any>> -> memref<1x128xf32, #tpu.memory_space<any>>
      %c12_i32_69 = arith.constant 12 : i32
      %c0_i32_70 = arith.constant 0 : i32
      %108 = tpu.memref_slice %arg6[%c12_i32_69, %c0_i32_70] : memref<16x128xf32, #tpu.memory_space<vmem>> -> memref<1x128xf32, #tpu.memory_space<vmem>>
      %109 = tpu.memref_slice %arg7[%c12_i32_67] : memref<16x!tpu.dma_semaphore, #tpu.memory_space<semaphore_mem>> -> memref<1x!tpu.dma_semaphore, #tpu.memory_space<semaphore_mem>>
      %110 = tpu.memref_squeeze %109 : memref<1x!tpu.dma_semaphore, #tpu.memory_space<semaphore_mem>> -> memref<!tpu.dma_semaphore, #tpu.memory_space<semaphore_mem>>
      tpu.enqueue_dma source(%107 : memref<1x128xf32, #tpu.memory_space<any>>) target(%108 : memref<1x128xf32, #tpu.memory_space<vmem>>) target_semaphore(%110 : memref<!tpu.dma_semaphore, #tpu.memory_space<semaphore_mem>>)
      %c16_i32_71 = arith.constant 16 : i32
      %111 = arith.muli %arg0, %c16_i32_71 : i32
      %c13_i32 = arith.constant 13 : i32
      %112 = arith.addi %111, %c13_i32 : i32
      %113 = arith.index_cast %112 : i32 to index
      %114 = memref.load %arg2[%113] : memref<16xi32, #tpu.memory_space<smem>>
      %c13_i32_72 = arith.constant 13 : i32
      %c0_i32_73 = arith.constant 0 : i32
      %115 = tpu.memref_slice %arg3[%114, %c0_i32_73] : memref<256x128xf32, #tpu.memory_space<any>> -> memref<1x128xf32, #tpu.memory_space<any>>
      %c13_i32_74 = arith.constant 13 : i32
      %c0_i32_75 = arith.constant 0 : i32
      %116 = tpu.memref_slice %arg6[%c13_i32_74, %c0_i32_75] : memref<16x128xf32, #tpu.memory_space<vmem>> -> memref<1x128xf32, #tpu.memory_space<vmem>>
      %117 = tpu.memref_slice %arg7[%c13_i32_72] : memref<16x!tpu.dma_semaphore, #tpu.memory_space<semaphore_mem>> -> memref<1x!tpu.dma_semaphore, #tpu.memory_space<semaphore_mem>>
      %118 = tpu.memref_squeeze %117 : memref<1x!tpu.dma_semaphore, #tpu.memory_space<semaphore_mem>> -> memref<!tpu.dma_semaphore, #tpu.memory_space<semaphore_mem>>
      tpu.enqueue_dma source(%115 : memref<1x128xf32, #tpu.memory_space<any>>) target(%116 : memref<1x128xf32, #tpu.memory_space<vmem>>) target_semaphore(%118 : memref<!tpu.dma_semaphore, #tpu.memory_space<semaphore_mem>>)
      %c16_i32_76 = arith.constant 16 : i32
      %119 = arith.muli %arg0, %c16_i32_76 : i32
      %c14_i32 = arith.constant 14 : i32
      %120 = arith.addi %119, %c14_i32 : i32
      %121 = arith.index_cast %120 : i32 to index
      %122 = memref.load %arg2[%121] : memref<16xi32, #tpu.memory_space<smem>>
      %c14_i32_77 = arith.constant 14 : i32
      %c0_i32_78 = arith.constant 0 : i32
      %123 = tpu.memref_slice %arg3[%122, %c0_i32_78] : memref<256x128xf32, #tpu.memory_space<any>> -> memref<1x128xf32, #tpu.memory_space<any>>
      %c14_i32_79 = arith.constant 14 : i32
      %c0_i32_80 = arith.constant 0 : i32
      %124 = tpu.memref_slice %arg6[%c14_i32_79, %c0_i32_80] : memref<16x128xf32, #tpu.memory_space<vmem>> -> memref<1x128xf32, #tpu.memory_space<vmem>>
      %125 = tpu.memref_slice %arg7[%c14_i32_77] : memref<16x!tpu.dma_semaphore, #tpu.memory_space<semaphore_mem>> -> memref<1x!tpu.dma_semaphore, #tpu.memory_space<semaphore_mem>>
      %126 = tpu.memref_squeeze %125 : memref<1x!tpu.dma_semaphore, #tpu.memory_space<semaphore_mem>> -> memref<!tpu.dma_semaphore, #tpu.memory_space<semaphore_mem>>
      tpu.enqueue_dma source(%123 : memref<1x128xf32, #tpu.memory_space<any>>) target(%124 : memref<1x128xf32, #tpu.memory_space<vmem>>) target_semaphore(%126 : memref<!tpu.dma_semaphore, #tpu.memory_space<semaphore_mem>>)
      %c16_i32_81 = arith.constant 16 : i32
      %127 = arith.muli %arg0, %c16_i32_81 : i32
      %c15_i32 = arith.constant 15 : i32
      %128 = arith.addi %127, %c15_i32 : i32
      %129 = arith.index_cast %128 : i32 to index
      %130 = memref.load %arg2[%129] : memref<16xi32, #tpu.memory_space<smem>>
      %c15_i32_82 = arith.constant 15 : i32
      %c0_i32_83 = arith.constant 0 : i32
      %131 = tpu.memref_slice %arg3[%130, %c0_i32_83] : memref<256x128xf32, #tpu.memory_space<any>> -> memref<1x128xf32, #tpu.memory_space<any>>
      %c15_i32_84 = arith.constant 15 : i32
      %c0_i32_85 = arith.constant 0 : i32
      %132 = tpu.memref_slice %arg6[%c15_i32_84, %c0_i32_85] : memref<16x128xf32, #tpu.memory_space<vmem>> -> memref<1x128xf32, #tpu.memory_space<vmem>>
      %133 = tpu.memref_slice %arg7[%c15_i32_82] : memref<16x!tpu.dma_semaphore, #tpu.memory_space<semaphore_mem>> -> memref<1x!tpu.dma_semaphore, #tpu.memory_space<semaphore_mem>>
      %134 = tpu.memref_squeeze %133 : memref<1x!tpu.dma_semaphore, #tpu.memory_space<semaphore_mem>> -> memref<!tpu.dma_semaphore, #tpu.memory_space<semaphore_mem>>
      tpu.enqueue_dma source(%131 : memref<1x128xf32, #tpu.memory_space<any>>) target(%132 : memref<1x128xf32, #tpu.memory_space<vmem>>) target_semaphore(%134 : memref<!tpu.dma_semaphore, #tpu.memory_space<semaphore_mem>>)
      %c0_i32_86 = arith.constant 0 : i32
      %c0_i32_87 = arith.constant 0 : i32
      %c0_i32_88 = arith.constant 0 : i32
      %135 = tpu.memref_slice %arg3[%c0_i32_87, %c0_i32_88] : memref<256x128xf32, #tpu.memory_space<any>> -> memref<1x128xf32, #tpu.memory_space<any>>
      %c0_i32_89 = arith.constant 0 : i32
      %c0_i32_90 = arith.constant 0 : i32
      %136 = tpu.memref_slice %arg6[%c0_i32_89, %c0_i32_90] : memref<16x128xf32, #tpu.memory_space<vmem>> -> memref<1x128xf32, #tpu.memory_space<vmem>>
      %137 = tpu.memref_slice %arg7[%c0_i32_86] : memref<16x!tpu.dma_semaphore, #tpu.memory_space<semaphore_mem>> -> memref<1x!tpu.dma_semaphore, #tpu.memory_space<semaphore_mem>>
      %138 = tpu.memref_squeeze %137 : memref<1x!tpu.dma_semaphore, #tpu.memory_space<semaphore_mem>> -> memref<!tpu.dma_semaphore, #tpu.memory_space<semaphore_mem>>
      tpu.wait_dma2 semaphore(%138 : memref<!tpu.dma_semaphore, #tpu.memory_space<semaphore_mem>>) src(%135 : memref<1x128xf32, #tpu.memory_space<any>>) dst(%136 : memref<1x128xf32, #tpu.memory_space<vmem>>)
      %c1_i32_91 = arith.constant 1 : i32
      %c0_i32_92 = arith.constant 0 : i32
      %c0_i32_93 = arith.constant 0 : i32
      %139 = tpu.memref_slice %arg3[%c0_i32_92, %c0_i32_93] : memref<256x128xf32, #tpu.memory_space<any>> -> memref<1x128xf32, #tpu.memory_space<any>>
      %c1_i32_94 = arith.constant 1 : i32
      %c0_i32_95 = arith.constant 0 : i32
      %140 = tpu.memref_slice %arg6[%c1_i32_94, %c0_i32_95] : memref<16x128xf32, #tpu.memory_space<vmem>> -> memref<1x128xf32, #tpu.memory_space<vmem>>
      %141 = tpu.memref_slice %arg7[%c1_i32_91] : memref<16x!tpu.dma_semaphore, #tpu.memory_space<semaphore_mem>> -> memref<1x!tpu.dma_semaphore, #tpu.memory_space<semaphore_mem>>
      %142 = tpu.memref_squeeze %141 : memref<1x!tpu.dma_semaphore, #tpu.memory_space<semaphore_mem>> -> memref<!tpu.dma_semaphore, #tpu.memory_space<semaphore_mem>>
      tpu.wait_dma2 semaphore(%142 : memref<!tpu.dma_semaphore, #tpu.memory_space<semaphore_mem>>) src(%139 : memref<1x128xf32, #tpu.memory_space<any>>) dst(%140 : memref<1x128xf32, #tpu.memory_space<vmem>>)
      %c2_i32_96 = arith.constant 2 : i32
      %c0_i32_97 = arith.constant 0 : i32
      %c0_i32_98 = arith.constant 0 : i32
      %143 = tpu.memref_slice %arg3[%c0_i32_97, %c0_i32_98] : memref<256x128xf32, #tpu.memory_space<any>> -> memref<1x128xf32, #tpu.memory_space<any>>
      %c2_i32_99 = arith.constant 2 : i32
      %c0_i32_100 = arith.constant 0 : i32
      %144 = tpu.memref_slice %arg6[%c2_i32_99, %c0_i32_100] : memref<16x128xf32, #tpu.memory_space<vmem>> -> memref<1x128xf32, #tpu.memory_space<vmem>>
      %145 = tpu.memref_slice %arg7[%c2_i32_96] : memref<16x!tpu.dma_semaphore, #tpu.memory_space<semaphore_mem>> -> memref<1x!tpu.dma_semaphore, #tpu.memory_space<semaphore_mem>>
      %146 = tpu.memref_squeeze %145 : memref<1x!tpu.dma_semaphore, #tpu.memory_space<semaphore_mem>> -> memref<!tpu.dma_semaphore, #tpu.memory_space<semaphore_mem>>
      tpu.wait_dma2 semaphore(%146 : memref<!tpu.dma_semaphore, #tpu.memory_space<semaphore_mem>>) src(%143 : memref<1x128xf32, #tpu.memory_space<any>>) dst(%144 : memref<1x128xf32, #tpu.memory_space<vmem>>)
      %c3_i32_101 = arith.constant 3 : i32
      %c0_i32_102 = arith.constant 0 : i32
      %c0_i32_103 = arith.constant 0 : i32
      %147 = tpu.memref_slice %arg3[%c0_i32_102, %c0_i32_103] : memref<256x128xf32, #tpu.memory_space<any>> -> memref<1x128xf32, #tpu.memory_space<any>>
      %c3_i32_104 = arith.constant 3 : i32
      %c0_i32_105 = arith.constant 0 : i32
      %148 = tpu.memref_slice %arg6[%c3_i32_104, %c0_i32_105] : memref<16x128xf32, #tpu.memory_space<vmem>> -> memref<1x128xf32, #tpu.memory_space<vmem>>
      %149 = tpu.memref_slice %arg7[%c3_i32_101] : memref<16x!tpu.dma_semaphore, #tpu.memory_space<semaphore_mem>> -> memref<1x!tpu.dma_semaphore, #tpu.memory_space<semaphore_mem>>
      %150 = tpu.memref_squeeze %149 : memref<1x!tpu.dma_semaphore, #tpu.memory_space<semaphore_mem>> -> memref<!tpu.dma_semaphore, #tpu.memory_space<semaphore_mem>>
      tpu.wait_dma2 semaphore(%150 : memref<!tpu.dma_semaphore, #tpu.memory_space<semaphore_mem>>) src(%147 : memref<1x128xf32, #tpu.memory_space<any>>) dst(%148 : memref<1x128xf32, #tpu.memory_space<vmem>>)
      %c4_i32_106 = arith.constant 4 : i32
      %c0_i32_107 = arith.constant 0 : i32
      %c0_i32_108 = arith.constant 0 : i32
      %151 = tpu.memref_slice %arg3[%c0_i32_107, %c0_i32_108] : memref<256x128xf32, #tpu.memory_space<any>> -> memref<1x128xf32, #tpu.memory_space<any>>
      %c4_i32_109 = arith.constant 4 : i32
      %c0_i32_110 = arith.constant 0 : i32
      %152 = tpu.memref_slice %arg6[%c4_i32_109, %c0_i32_110] : memref<16x128xf32, #tpu.memory_space<vmem>> -> memref<1x128xf32, #tpu.memory_space<vmem>>
      %153 = tpu.memref_slice %arg7[%c4_i32_106] : memref<16x!tpu.dma_semaphore, #tpu.memory_space<semaphore_mem>> -> memref<1x!tpu.dma_semaphore, #tpu.memory_space<semaphore_mem>>
      %154 = tpu.memref_squeeze %153 : memref<1x!tpu.dma_semaphore, #tpu.memory_space<semaphore_mem>> -> memref<!tpu.dma_semaphore, #tpu.memory_space<semaphore_mem>>
      tpu.wait_dma2 semaphore(%154 : memref<!tpu.dma_semaphore, #tpu.memory_space<semaphore_mem>>) src(%151 : memref<1x128xf32, #tpu.memory_space<any>>) dst(%152 : memref<1x128xf32, #tpu.memory_space<vmem>>)
      %c5_i32_111 = arith.constant 5 : i32
      %c0_i32_112 = arith.constant 0 : i32
      %c0_i32_113 = arith.constant 0 : i32
      %155 = tpu.memref_slice %arg3[%c0_i32_112, %c0_i32_113] : memref<256x128xf32, #tpu.memory_space<any>> -> memref<1x128xf32, #tpu.memory_space<any>>
      %c5_i32_114 = arith.constant 5 : i32
      %c0_i32_115 = arith.constant 0 : i32
      %156 = tpu.memref_slice %arg6[%c5_i32_114, %c0_i32_115] : memref<16x128xf32, #tpu.memory_space<vmem>> -> memref<1x128xf32, #tpu.memory_space<vmem>>
      %157 = tpu.memref_slice %arg7[%c5_i32_111] : memref<16x!tpu.dma_semaphore, #tpu.memory_space<semaphore_mem>> -> memref<1x!tpu.dma_semaphore, #tpu.memory_space<semaphore_mem>>
      %158 = tpu.memref_squeeze %157 : memref<1x!tpu.dma_semaphore, #tpu.memory_space<semaphore_mem>> -> memref<!tpu.dma_semaphore, #tpu.memory_space<semaphore_mem>>
      tpu.wait_dma2 semaphore(%158 : memref<!tpu.dma_semaphore, #tpu.memory_space<semaphore_mem>>) src(%155 : memref<1x128xf32, #tpu.memory_space<any>>) dst(%156 : memref<1x128xf32, #tpu.memory_space<vmem>>)
      %c6_i32_116 = arith.constant 6 : i32
      %c0_i32_117 = arith.constant 0 : i32
      %c0_i32_118 = arith.constant 0 : i32
      %159 = tpu.memref_slice %arg3[%c0_i32_117, %c0_i32_118] : memref<256x128xf32, #tpu.memory_space<any>> -> memref<1x128xf32, #tpu.memory_space<any>>
      %c6_i32_119 = arith.constant 6 : i32
      %c0_i32_120 = arith.constant 0 : i32
      %160 = tpu.memref_slice %arg6[%c6_i32_119, %c0_i32_120] : memref<16x128xf32, #tpu.memory_space<vmem>> -> memref<1x128xf32, #tpu.memory_space<vmem>>
      %161 = tpu.memref_slice %arg7[%c6_i32_116] : memref<16x!tpu.dma_semaphore, #tpu.memory_space<semaphore_mem>> -> memref<1x!tpu.dma_semaphore, #tpu.memory_space<semaphore_mem>>
      %162 = tpu.memref_squeeze %161 : memref<1x!tpu.dma_semaphore, #tpu.memory_space<semaphore_mem>> -> memref<!tpu.dma_semaphore, #tpu.memory_space<semaphore_mem>>
      tpu.wait_dma2 semaphore(%162 : memref<!tpu.dma_semaphore, #tpu.memory_space<semaphore_mem>>) src(%159 : memref<1x128xf32, #tpu.memory_space<any>>) dst(%160 : memref<1x128xf32, #tpu.memory_space<vmem>>)
      %c7_i32_121 = arith.constant 7 : i32
      %c0_i32_122 = arith.constant 0 : i32
      %c0_i32_123 = arith.constant 0 : i32
      %163 = tpu.memref_slice %arg3[%c0_i32_122, %c0_i32_123] : memref<256x128xf32, #tpu.memory_space<any>> -> memref<1x128xf32, #tpu.memory_space<any>>
      %c7_i32_124 = arith.constant 7 : i32
      %c0_i32_125 = arith.constant 0 : i32
      %164 = tpu.memref_slice %arg6[%c7_i32_124, %c0_i32_125] : memref<16x128xf32, #tpu.memory_space<vmem>> -> memref<1x128xf32, #tpu.memory_space<vmem>>
      %165 = tpu.memref_slice %arg7[%c7_i32_121] : memref<16x!tpu.dma_semaphore, #tpu.memory_space<semaphore_mem>> -> memref<1x!tpu.dma_semaphore, #tpu.memory_space<semaphore_mem>>
      %166 = tpu.memref_squeeze %165 : memref<1x!tpu.dma_semaphore, #tpu.memory_space<semaphore_mem>> -> memref<!tpu.dma_semaphore, #tpu.memory_space<semaphore_mem>>
      tpu.wait_dma2 semaphore(%166 : memref<!tpu.dma_semaphore, #tpu.memory_space<semaphore_mem>>) src(%163 : memref<1x128xf32, #tpu.memory_space<any>>) dst(%164 : memref<1x128xf32, #tpu.memory_space<vmem>>)
      %c8_i32_126 = arith.constant 8 : i32
      %c0_i32_127 = arith.constant 0 : i32
      %c0_i32_128 = arith.constant 0 : i32
      %167 = tpu.memref_slice %arg3[%c0_i32_127, %c0_i32_128] : memref<256x128xf32, #tpu.memory_space<any>> -> memref<1x128xf32, #tpu.memory_space<any>>
      %c8_i32_129 = arith.constant 8 : i32
      %c0_i32_130 = arith.constant 0 : i32
      %168 = tpu.memref_slice %arg6[%c8_i32_129, %c0_i32_130] : memref<16x128xf32, #tpu.memory_space<vmem>> -> memref<1x128xf32, #tpu.memory_space<vmem>>
      %169 = tpu.memref_slice %arg7[%c8_i32_126] : memref<16x!tpu.dma_semaphore, #tpu.memory_space<semaphore_mem>> -> memref<1x!tpu.dma_semaphore, #tpu.memory_space<semaphore_mem>>
      %170 = tpu.memref_squeeze %169 : memref<1x!tpu.dma_semaphore, #tpu.memory_space<semaphore_mem>> -> memref<!tpu.dma_semaphore, #tpu.memory_space<semaphore_mem>>
      tpu.wait_dma2 semaphore(%170 : memref<!tpu.dma_semaphore, #tpu.memory_space<semaphore_mem>>) src(%167 : memref<1x128xf32, #tpu.memory_space<any>>) dst(%168 : memref<1x128xf32, #tpu.memory_space<vmem>>)
      %c9_i32_131 = arith.constant 9 : i32
      %c0_i32_132 = arith.constant 0 : i32
      %c0_i32_133 = arith.constant 0 : i32
      %171 = tpu.memref_slice %arg3[%c0_i32_132, %c0_i32_133] : memref<256x128xf32, #tpu.memory_space<any>> -> memref<1x128xf32, #tpu.memory_space<any>>
      %c9_i32_134 = arith.constant 9 : i32
      %c0_i32_135 = arith.constant 0 : i32
      %172 = tpu.memref_slice %arg6[%c9_i32_134, %c0_i32_135] : memref<16x128xf32, #tpu.memory_space<vmem>> -> memref<1x128xf32, #tpu.memory_space<vmem>>
      %173 = tpu.memref_slice %arg7[%c9_i32_131] : memref<16x!tpu.dma_semaphore, #tpu.memory_space<semaphore_mem>> -> memref<1x!tpu.dma_semaphore, #tpu.memory_space<semaphore_mem>>
      %174 = tpu.memref_squeeze %173 : memref<1x!tpu.dma_semaphore, #tpu.memory_space<semaphore_mem>> -> memref<!tpu.dma_semaphore, #tpu.memory_space<semaphore_mem>>
      tpu.wait_dma2 semaphore(%174 : memref<!tpu.dma_semaphore, #tpu.memory_space<semaphore_mem>>) src(%171 : memref<1x128xf32, #tpu.memory_space<any>>) dst(%172 : memref<1x128xf32, #tpu.memory_space<vmem>>)
      %c10_i32_136 = arith.constant 10 : i32
      %c0_i32_137 = arith.constant 0 : i32
      %c0_i32_138 = arith.constant 0 : i32
      %175 = tpu.memref_slice %arg3[%c0_i32_137, %c0_i32_138] : memref<256x128xf32, #tpu.memory_space<any>> -> memref<1x128xf32, #tpu.memory_space<any>>
      %c10_i32_139 = arith.constant 10 : i32
      %c0_i32_140 = arith.constant 0 : i32
      %176 = tpu.memref_slice %arg6[%c10_i32_139, %c0_i32_140] : memref<16x128xf32, #tpu.memory_space<vmem>> -> memref<1x128xf32, #tpu.memory_space<vmem>>
      %177 = tpu.memref_slice %arg7[%c10_i32_136] : memref<16x!tpu.dma_semaphore, #tpu.memory_space<semaphore_mem>> -> memref<1x!tpu.dma_semaphore, #tpu.memory_space<semaphore_mem>>
      %178 = tpu.memref_squeeze %177 : memref<1x!tpu.dma_semaphore, #tpu.memory_space<semaphore_mem>> -> memref<!tpu.dma_semaphore, #tpu.memory_space<semaphore_mem>>
      tpu.wait_dma2 semaphore(%178 : memref<!tpu.dma_semaphore, #tpu.memory_space<semaphore_mem>>) src(%175 : memref<1x128xf32, #tpu.memory_space<any>>) dst(%176 : memref<1x128xf32, #tpu.memory_space<vmem>>)
      %c11_i32_141 = arith.constant 11 : i32
      %c0_i32_142 = arith.constant 0 : i32
      %c0_i32_143 = arith.constant 0 : i32
      %179 = tpu.memref_slice %arg3[%c0_i32_142, %c0_i32_143] : memref<256x128xf32, #tpu.memory_space<any>> -> memref<1x128xf32, #tpu.memory_space<any>>
      %c11_i32_144 = arith.constant 11 : i32
      %c0_i32_145 = arith.constant 0 : i32
      %180 = tpu.memref_slice %arg6[%c11_i32_144, %c0_i32_145] : memref<16x128xf32, #tpu.memory_space<vmem>> -> memref<1x128xf32, #tpu.memory_space<vmem>>
      %181 = tpu.memref_slice %arg7[%c11_i32_141] : memref<16x!tpu.dma_semaphore, #tpu.memory_space<semaphore_mem>> -> memref<1x!tpu.dma_semaphore, #tpu.memory_space<semaphore_mem>>
      %182 = tpu.memref_squeeze %181 : memref<1x!tpu.dma_semaphore, #tpu.memory_space<semaphore_mem>> -> memref<!tpu.dma_semaphore, #tpu.memory_space<semaphore_mem>>
      tpu.wait_dma2 semaphore(%182 : memref<!tpu.dma_semaphore, #tpu.memory_space<semaphore_mem>>) src(%179 : memref<1x128xf32, #tpu.memory_space<any>>) dst(%180 : memref<1x128xf32, #tpu.memory_space<vmem>>)
      %c12_i32_146 = arith.constant 12 : i32
      %c0_i32_147 = arith.constant 0 : i32
      %c0_i32_148 = arith.constant 0 : i32
      %183 = tpu.memref_slice %arg3[%c0_i32_147, %c0_i32_148] : memref<256x128xf32, #tpu.memory_space<any>> -> memref<1x128xf32, #tpu.memory_space<any>>
      %c12_i32_149 = arith.constant 12 : i32
      %c0_i32_150 = arith.constant 0 : i32
      %184 = tpu.memref_slice %arg6[%c12_i32_149, %c0_i32_150] : memref<16x128xf32, #tpu.memory_space<vmem>> -> memref<1x128xf32, #tpu.memory_space<vmem>>
      %185 = tpu.memref_slice %arg7[%c12_i32_146] : memref<16x!tpu.dma_semaphore, #tpu.memory_space<semaphore_mem>> -> memref<1x!tpu.dma_semaphore, #tpu.memory_space<semaphore_mem>>
      %186 = tpu.memref_squeeze %185 : memref<1x!tpu.dma_semaphore, #tpu.memory_space<semaphore_mem>> -> memref<!tpu.dma_semaphore, #tpu.memory_space<semaphore_mem>>
      tpu.wait_dma2 semaphore(%186 : memref<!tpu.dma_semaphore, #tpu.memory_space<semaphore_mem>>) src(%183 : memref<1x128xf32, #tpu.memory_space<any>>) dst(%184 : memref<1x128xf32, #tpu.memory_space<vmem>>)
      %c13_i32_151 = arith.constant 13 : i32
      %c0_i32_152 = arith.constant 0 : i32
      %c0_i32_153 = arith.constant 0 : i32
      %187 = tpu.memref_slice %arg3[%c0_i32_152, %c0_i32_153] : memref<256x128xf32, #tpu.memory_space<any>> -> memref<1x128xf32, #tpu.memory_space<any>>
      %c13_i32_154 = arith.constant 13 : i32
      %c0_i32_155 = arith.constant 0 : i32
      %188 = tpu.memref_slice %arg6[%c13_i32_154, %c0_i32_155] : memref<16x128xf32, #tpu.memory_space<vmem>> -> memref<1x128xf32, #tpu.memory_space<vmem>>
      %189 = tpu.memref_slice %arg7[%c13_i32_151] : memref<16x!tpu.dma_semaphore, #tpu.memory_space<semaphore_mem>> -> memref<1x!tpu.dma_semaphore, #tpu.memory_space<semaphore_mem>>
      %190 = tpu.memref_squeeze %189 : memref<1x!tpu.dma_semaphore, #tpu.memory_space<semaphore_mem>> -> memref<!tpu.dma_semaphore, #tpu.memory_space<semaphore_mem>>
      tpu.wait_dma2 semaphore(%190 : memref<!tpu.dma_semaphore, #tpu.memory_space<semaphore_mem>>) src(%187 : memref<1x128xf32, #tpu.memory_space<any>>) dst(%188 : memref<1x128xf32, #tpu.memory_space<vmem>>)
      %c14_i32_156 = arith.constant 14 : i32
      %c0_i32_157 = arith.constant 0 : i32
      %c0_i32_158 = arith.constant 0 : i32
      %191 = tpu.memref_slice %arg3[%c0_i32_157, %c0_i32_158] : memref<256x128xf32, #tpu.memory_space<any>> -> memref<1x128xf32, #tpu.memory_space<any>>
      %c14_i32_159 = arith.constant 14 : i32
      %c0_i32_160 = arith.constant 0 : i32
      %192 = tpu.memref_slice %arg6[%c14_i32_159, %c0_i32_160] : memref<16x128xf32, #tpu.memory_space<vmem>> -> memref<1x128xf32, #tpu.memory_space<vmem>>
      %193 = tpu.memref_slice %arg7[%c14_i32_156] : memref<16x!tpu.dma_semaphore, #tpu.memory_space<semaphore_mem>> -> memref<1x!tpu.dma_semaphore, #tpu.memory_space<semaphore_mem>>
      %194 = tpu.memref_squeeze %193 : memref<1x!tpu.dma_semaphore, #tpu.memory_space<semaphore_mem>> -> memref<!tpu.dma_semaphore, #tpu.memory_space<semaphore_mem>>
      tpu.wait_dma2 semaphore(%194 : memref<!tpu.dma_semaphore, #tpu.memory_space<semaphore_mem>>) src(%191 : memref<1x128xf32, #tpu.memory_space<any>>) dst(%192 : memref<1x128xf32, #tpu.memory_space<vmem>>)
      %c15_i32_161 = arith.constant 15 : i32
      %c0_i32_162 = arith.constant 0 : i32
      %c0_i32_163 = arith.constant 0 : i32
      %195 = tpu.memref_slice %arg3[%c0_i32_162, %c0_i32_163] : memref<256x128xf32, #tpu.memory_space<any>> -> memref<1x128xf32, #tpu.memory_space<any>>
      %c15_i32_164 = arith.constant 15 : i32
      %c0_i32_165 = arith.constant 0 : i32
      %196 = tpu.memref_slice %arg6[%c15_i32_164, %c0_i32_165] : memref<16x128xf32, #tpu.memory_space<vmem>> -> memref<1x128xf32, #tpu.memory_space<vmem>>
      %197 = tpu.memref_slice %arg7[%c15_i32_161] : memref<16x!tpu.dma_semaphore, #tpu.memory_space<semaphore_mem>> -> memref<1x!tpu.dma_semaphore, #tpu.memory_space<semaphore_mem>>
      %198 = tpu.memref_squeeze %197 : memref<1x!tpu.dma_semaphore, #tpu.memory_space<semaphore_mem>> -> memref<!tpu.dma_semaphore, #tpu.memory_space<semaphore_mem>>
      tpu.wait_dma2 semaphore(%198 : memref<!tpu.dma_semaphore, #tpu.memory_space<semaphore_mem>>) src(%195 : memref<1x128xf32, #tpu.memory_space<any>>) dst(%196 : memref<1x128xf32, #tpu.memory_space<vmem>>)
    } else {
    }
    %c0 = arith.constant 0 : index
    %c0_1 = arith.constant 0 : index
    %3 = vector.load %arg6[%c0, %c0_1] : memref<16x128xf32, #tpu.memory_space<vmem>>, vector<16x128xf32>
    %c0_2 = arith.constant 0 : index
    %c0_3 = arith.constant 0 : index
    %4 = vector.load %arg4[%c0_2, %c0_3] : memref<128x128xf32, #tpu.memory_space<vmem>>, vector<128x128xf32>
    %cst = arith.constant dense<0.000000e+00> : vector<16x128xf32>
    %5 = tpu.matmul %3, %4, %cst {dimension_numbers = #tpu.dot_dimension_numbers<[1], [1], [0], [0], [0, 0, 1, 0], [], []>} : vector<16x128xf32>, vector<128x128xf32>, vector<16x128xf32> -> vector<16x128xf32>
    %c0_4 = arith.constant 0 : index
    %c0_5 = arith.constant 0 : index
    %6 = vector.load %arg5[%c0_4, %c0_5] : memref<16x128xf32, #tpu.memory_space<vmem>>, vector<16x128xf32>
    tpu.vector_store %arg5[%c0_4, %c0_5], %5 {strides = array<i32>} : memref<16x128xf32, #tpu.memory_space<vmem>>, vector<16x128xf32>,
    return
  }
  func.func @transform_1(%arg0: i32, %arg1: i32, %arg2: memref<16xi32, #tpu.memory_space<smem>>) -> (i32, i32) {
    %c0_i32 = arith.constant 0 : i32
    %c0_i32_0 = arith.constant 0 : i32
    return %arg1, %c0_i32 : i32, i32
  }
  func.func @transform_2(%arg0: i32, %arg1: i32, %arg2: memref<16xi32, #tpu.memory_space<smem>>) -> (i32, i32) {
    %c0_i32 = arith.constant 0 : i32
    return %arg0, %arg1 : i32, i32
  }
}

</mosaic_0001>

<bundles_post_ra>
// kernel: tpu_custom_call.1
= control target key start
LH: loop header
LB: loop body
LE: loop exit
PB: predicated region body
PF: predicated region fallthrough
CT: control target
= control target key end

     0   :  { %s1448_s15 = smov [#allocation5]   ;;  %s1809_s0 = inlined_call_operand.hbm [shape: s32[16], index: 0, kind: input, shape index: {}]   ;;  %s1810_s1 = inlined_call_operand.hbm [shape: f32[256,128], index: 1, kind: input, shape index: {}]   ;;  %s1811_s2 = inlined_call_operand.hbm [shape: f32[256,128], index: 2, kind: input, shape index: {}]   ;;  %s1812_s3 = inlined_call_operand.hbm [shape: f32[16,256], index: 3, kind: output, shape index: {}]  }
   0x1   :  { %1817 = sst [smem:[#allocation68_spill]] %s1811_s2  ;;  %s9_s14 = sshll.u32 %s1809_s0, 4  ;;  %s10_s14 = int_to_ptr.hbm [resolvable:$true] %s9_s14 }
   0x2   :  { %12 = dma.hbm_to_smem %s10_s14, 16, %s1448_s15, [#allocation4] }
   0x3   :  { %1382 = dma.done.wait [#allocation4], 16 }
   0x4   :  { %1383 = vsyncadd [#allocation4], 4294967280 }
   0x5   :  { %15 = sfence }
   0x6   :  { %16 = vsyncpa [#allocation7], 0 }
   0x7   :  { %18 = vsyncpa [#allocation7 + $0x1], 0 }
   0x8   :  { %19 = vsyncpa [#allocation8], 0 }
   0x9   :  { %21 = vsyncpa [#allocation8 + $0x1], 0  ;;  %s1493_s16 = smov 0   ;;  %s1495_s17 = smov 0  }
   0xa   :  { %s1497_s18 = smov 0   ;;  %s1499_s19 = smov 0  }
   0xb   :  { %s1501_s20 = smov 0   ;;  %s1503_s0 = smov 0  }
   0xc LB: > { %1818 = sst [smem:[#allocation63_spill]] %s1434_s18  ;;  %s757_s21 = sadd.s32 4294967295, %s1446_s0   ;;  %s1446_s0 = sphi %s1503_s0, %s27_s0   ;;  %s1442_s20 = sphi %s1501_s20, %s1833_s20   ;;  %s1438_s19 = sphi %s1499_s19, %s1832_s19   ;;  %s1434_s18 = sphi %s1497_s18, %s1831_s18   ;;  %s1430_s17 = sphi %s1495_s17, %s1835_s17   ;;  %s1426_s16 = sphi %s1493_s16, %s1834_s16  }
   0xd   : > { %1819 = sst [smem:[#allocation64_spill]] %s1442_s20  ;;  %s758_s22 = sadd.s32 4294967294, %s1446_s0  }
   0xe   : > { %s36_s23 = sadd.s32 1, %s1442_s20  ;;  %s46_s24 = sadd.s32 1, %s1434_s18 }
   0xf   : > { %p37_p0 = scmp.ge.s32.totalorder %s36_s23, 2  ;;  %p53_p1 = scmp.ne.s32.totalorder %s1434_s18, %s1430_s17 }
  0x10   : > { %p54_p2 = scmp.eq.s32.totalorder %s1446_s0, 0  ;;  %p59_p3 = scmp.ne.s32.totalorder %s1430_s17, %s1426_s16 }
  0x11   : > { %s1837_s23 = smov (%p37_p0, %s36_s23), 0  ;;  %p60_p5 = scmp.eq.s32.totalorder %s757_s21, 0 }
  0x12   : > { %1820 = sst [smem:[#allocation65_spill]] %s1837_s23  ;;  %p1534_p4 = por %p54_p2, %p53_p1 }
  0x13   : > { %s43_s26 = ssub.s32 %s1442_s20, %s1837_s23  ;;  %p85_p6 = scmp.eq.s32.totalorder %s757_s21, 1 }
  0x14   : > { %p44_p7 = scmp.eq.s32.totalorder %s43_s26, 0  ;;  %p1540_p8 = por %p60_p5, %p59_p3 }
  0x15   : > { %p1544_p9 = por %p85_p6, %p53_p1  ;;  %p91_p10 = scmp.eq.s32.totalorder %s758_s22, 1 }
  0x16   : > { %s1549_s29 = scalar_select %p44_p7, %s1434_s18, %s46_s24  }
  0x17   : > { %p1551_p11 = por %p91_p10, %p59_p3  ;;  %p760_p12 = scmp.ge.s32.totalorder %s1446_s0, 2 }
  0x18   : > { %1824 = sst [smem:[#allocation66_spill]] %s1549_s29  ;;  %p832_p13 = scmp.lt.s32.totalorder %s1446_s0, 2 }
  0x19   : > { %s111_s4 = sand.u32 1, %s1434_s18   ;;  %s803_s6 = sshll.u32 %s1442_s20, 7 }
  0x1a   : > { %s761_s5 = sshll.u32 %s111_s4, 7  ;;  %s1826_s2 = sld [smem:[#allocation68_spill]] }
  0x1b   : > { %s115_s10 = scalar_lea.vmem [#allocation6], %s761_s5  ;;  %p825_p0 = pnand %p832_p13, %p1534_p4 }
  0x1c   : > { %s123_s11 = sshll.u32 %s115_s10, 4  ;;  %p764_p1 = scmp.ge.s32.totalorder %s1446_s0, 1  ;;  %s124_s11 = int_to_ptr.vmem [resolvable:$true] %s123_s11 }
  0x1d   : > { %s112_s13 = scalar_lea.sflag [#allocation7], %s111_s4  ;;  %s1449_s14 = smov 128  }
  0x1e   : > { %s1450_s15 = smov 8   ;;  %p131_p2 = scmp.lt.s32.totalorder %s1446_s0, 3 }
  0x20   : > { %s120_s9 = scalar_lea.hbm %s1826_s2, %s803_s6  ;;  %p132_p3 = pnand %p764_p1, %p131_p2 }
  0x21   : > { %s121_s12 = sshll.u32 %s120_s9, 4  ;;  %s1567_s21 = sand.u32 (!%p132_p3), 1, %s1430_s17   ;;  %s122_s12 = int_to_ptr.hbm [resolvable:$true] %s121_s12 }
  0x22   : > { %827 = dma.hbm_to_vmem [thread:$0]  (!%p825_p0), %s122_s12, 2048, %s124_s11, %s112_s13, %s1449_s14, %s1449_s14, %s1450_s15  }
  0x23   : > { %135 = sbr.rel (%p132_p3) target bundleno = 476 (0x1dc), region = 24  ;;  %s765_s22 = sshll.u32 (!%p132_p3), %s1567_s21, 7 }
  0x24   : > { %s138_s24 = scalar_lea.sflag (!%p132_p3), [#allocation7], %s1567_s21  ;;  %s1571_s26 = scalar_lea.vmem (!%p132_p3), [#allocation6], %s765_s22 }
  0x28   : > { %1385 = dma.done.wait (%p1540_p8), %s138_s24, 2048  }
  0x29   : > { %1387 = vsyncadd (%p1540_p8), %s138_s24, 4294965248  ;;  %s766_s25 = sshll.u32 %s1567_s21, 4  ;;  %p767_p4 = scmp.ne.s32.totalorder %s1438_s19, 0 }
  0x2a   : > { %s1578_s4 = scalar_lea.vmem [#allocation9], %s766_s25 }
  0x2b   : > { %166 = sbr.rel (%p767_p4) target bundleno = 280 (0x118), region = 32 }
  0x30   : > { %s168_s5 = sld [smem:[#allocation5]]  ;;  %s1451_s6 = smov [#allocation2]  }
  0x31   : > { %s179_s7 = sshll.u32 %s1451_s6, 4  ;;  %s768_s8 = sld [smem:[#allocation5 + $0x1]]  ;;  %s180_s7 = int_to_ptr.vmem [resolvable:$true] %s179_s7 }
  0x32   : > { %s1452_s9 = smov [#allocation2 + $0x1]   ;;  %s1583_s11 = sld [smem:[#allocation5 + $0x2]] }
  0x33   : > { %s1581_s10 = sshll.u32 %s1452_s9, 4  ;;  %s1453_s27 = smov [#allocation2 + $0x2]  }
  0x34   : > { %1827 = sst [smem:[#allocation67_spill]] %s1581_s10  ;;  %s1586_s12 = sshll.u32 %s1453_s27, 4  ;;  %s216_s12 = int_to_ptr.vmem [resolvable:$true] %s1586_s12 }
  0x35   : > { %s1588_s13 = sld [smem:[#allocation5 + $0x3]]  ;;  %s1600_s29 = scalar_lea.hbm %s1810_s1, 256 }
  0x36   : > { %s169_s22 = scalar_lea.hbm %s1810_s1, %s168_s5 }
  0x37   : > { %s177_s24 = sshll.u32 %s169_s22, 4  ;;  %s185_s9 = scalar_lea.hbm %s1810_s1, %s768_s8  ;;  %s178_s24 = int_to_ptr.hbm [resolvable:$true] %s177_s24 }
  0x38   : > { %s195_s2 = sshll.u32 %s185_s9, 4  ;;  %s946_s23 = sshra.s32 %s178_s24, 4  ;;  %s947_s23 = int_to_ptr.hbm [resolvable:$true] %s946_s23  ;;  %s196_s2 = int_to_ptr.hbm [resolvable:$true] %s195_s2 }
  0x39   : > { %s948_s10 = scalar_lea.hbm %s947_s23, 1  ;;  %p951_p6 = scmp.lt.s32.totalorder %s947_s23, %s1810_s1 }
  0x3a   : > { %p949_p5 = scmp.ne.s32.totalorder %s947_s23, %s948_s10  ;;  %p952_p7 = scmp.lt.s32.totalorder %s1600_s29, %s948_s10 }
  0x3c   : > { %p953_p8 = por %p952_p7, %p951_p6 }
  0x3e   : > { %p954_p10 = pnand %p953_p8, %p949_p5 }
  0x40   : > { %957 = shalt.err (!%p954_p10)  }
  0x41   : > { %182 = dma.hbm_to_vmem [thread:$0]  %s178_s24, 16, %s180_s7, [#allocation3] }
  0x42   : > { %s203_s15 = scalar_lea.hbm %s1810_s1, %s1583_s11  ;;  %s970_s20 = sshra.s32 %s196_s2, 4  ;;  %s971_s20 = int_to_ptr.hbm [resolvable:$true] %s970_s20 }
  0x43   : > { %s972_s22 = scalar_lea.hbm %s971_s20, 1  ;;  %p975_p0 = scmp.lt.s32.totalorder %s971_s20, %s1810_s1 }
  0x44   : > { %p973_p13 = scmp.ne.s32.totalorder %s971_s20, %s972_s22  ;;  %p976_p1 = scmp.lt.s32.totalorder %s1600_s29, %s972_s22 }
  0x46   : > { %p977_p2 = por %p976_p1, %p975_p0 }
  0x48   : > { %p978_p3 = pnand %p977_p2, %p973_p13 }
  0x4a   : > { %981 = shalt.err (!%p978_p3)  }
  0x4b   : > { %s1828_s23 = sld [smem:[#allocation67_spill]]  ;;  %s213_s10 = sshll.u32 %s203_s15, 4  ;;  %s214_s10 = int_to_ptr.hbm [resolvable:$true] %s213_s10 }
  0x4c   : > { %s221_s6 = scalar_lea.hbm %s1810_s1, %s1588_s13  ;;  %s994_s27 = sshra.s32 %s214_s10, 4  ;;  %s995_s27 = int_to_ptr.hbm [resolvable:$true] %s994_s27 }
  0x4d   : > { %s231_s9 = sshll.u32 %s221_s6, 4  ;;  %s996_s14 = scalar_lea.hbm %s995_s27, 1  ;;  %s232_s9 = int_to_ptr.hbm [resolvable:$true] %s231_s9 }
  0x4e   : > { %p997_p4 = scmp.ne.s32.totalorder %s995_s27, %s996_s14  ;;  %p999_p5 = scmp.lt.s32.totalorder %s995_s27, %s1810_s1 }
  0x4f   : > { %p1000_p6 = scmp.lt.s32.totalorder %s1600_s29, %s996_s14 }
  0x51   : > { %s1829_s7 = int_to_ptr.vmem [resolvable:$true] %s1828_s23  ;;  %p1001_p7 = por %p1000_p6, %p999_p5 }
  0x52   : > { %200 = dma.hbm_to_vmem [thread:$0]  %s196_s2, 16, %s1829_s7, [#allocation3 + $0x1] }
  0x53   : > { %p1002_p8 = pnand %p1001_p7, %p997_p4 }
  0x55   : > { %1005 = shalt.err (!%p1002_p8)  }
  0x56   : > { %218 = dma.hbm_to_vmem [thread:$0]  %s214_s10, 16, %s216_s12, [#allocation3 + $0x2] }
  0x57   : > { %s1454_s2 = smov [#allocation2 + $0x3]   ;;  %s771_s15 = sld [smem:[#allocation5 + $0x4]] }
  0x58   : > { %s233_s13 = sshll.u32 %s1454_s2, 4  ;;  %s1018_s20 = sshra.s32 %s232_s9, 4  ;;  %s234_s13 = int_to_ptr.vmem [resolvable:$true] %s233_s13  ;;  %s1019_s20 = int_to_ptr.hbm [resolvable:$true] %s1018_s20 }
  0x59   : > { %s1020_s22 = scalar_lea.hbm %s1019_s20, 1  ;;  %p1023_p13 = scmp.lt.s32.totalorder %s1019_s20, %s1810_s1 }
  0x5a   : > { %p1021_p10 = scmp.ne.s32.totalorder %s1019_s20, %s1020_s22  ;;  %p1024_p0 = scmp.lt.s32.totalorder %s1600_s29, %s1020_s22 }
  0x5c   : > { %p1025_p1 = por %p1024_p0, %p1023_p13 }
  0x5e   : > { %p1026_p2 = pnand %p1025_p1, %p1021_p10 }
  0x60   : > { %1029 = shalt.err (!%p1026_p2)  }
  0x61   : > { %236 = dma.hbm_to_vmem [thread:$0]  %s232_s9, 16, %s234_s13, [#allocation3 + $0x3] }
  0x62   : > { %s1455_s23 = smov [#allocation2 + $0x4]   ;;  %s772_s7 = sld [smem:[#allocation5 + $0x5]] }
  0x63   : > { %s251_s12 = sshll.u32 %s1455_s23, 4  ;;  %s1456_s10 = smov [#allocation2 + $0x5]   ;;  %s252_s12 = int_to_ptr.vmem [resolvable:$true] %s251_s12 }
  0x64   : > { %s1630_s24 = sshll.u32 %s1456_s10, 4  ;;  %s773_s11 = sld [smem:[#allocation5 + $0x6]]  ;;  %s270_s24 = int_to_ptr.vmem [resolvable:$true] %s1630_s24 }
  0x65   : > { %s239_s14 = scalar_lea.hbm %s1810_s1, %s771_s15  ;;  %s1457_s8 = smov [#allocation2 + $0x6]  }
  0x66   : > { %s249_s5 = sshll.u32 %s239_s14, 4  ;;  %s1636_s2 = sshll.u32 %s1457_s8, 4  ;;  %s250_s5 = int_to_ptr.hbm [resolvable:$true] %s249_s5  ;;  %s288_s2 = int_to_ptr.vmem [resolvable:$true] %s1636_s2 }
  0x67   : > { %s1042_s9 = sshra.s32 %s250_s5, 4  ;;  %s1043_s9 = int_to_ptr.hbm [resolvable:$true] %s1042_s9 }
  0x68   : > { %s1044_s13 = scalar_lea.hbm %s1043_s9, 1  ;;  %p1047_p4 = scmp.lt.s32.totalorder %s1043_s9, %s1810_s1 }
  0x69   : > { %p1045_p3 = scmp.ne.s32.totalorder %s1043_s9, %s1044_s13  ;;  %p1048_p5 = scmp.lt.s32.totalorder %s1600_s29, %s1044_s13 }
  0x6b   : > { %p1049_p6 = por %p1048_p5, %p1047_p4 }
  0x6d   : > { %p1050_p7 = pnand %p1049_p6, %p1045_p3 }
  0x6f   : > { %1053 = shalt.err (!%p1050_p7)  }
  0x70   : > { %254 = dma.hbm_to_vmem [thread:$0]  %s250_s5, 16, %s252_s12, [#allocation3 + $0x4] }
  0x71   : > { %s257_s18 = scalar_lea.hbm %s1810_s1, %s772_s7  ;;  %s275_s27 = scalar_lea.hbm %s1810_s1, %s773_s11 }
  0x72   : > { %s267_s23 = sshll.u32 %s257_s18, 4  ;;  %s285_s14 = sshll.u32 %s275_s27, 4  ;;  %s268_s23 = int_to_ptr.hbm [resolvable:$true] %s267_s23  ;;  %s286_s14 = int_to_ptr.hbm [resolvable:$true] %s285_s14 }
  0x73   : > { %s1066_s8 = sshra.s32 %s268_s23, 4  ;;  %s1067_s8 = int_to_ptr.hbm [resolvable:$true] %s1066_s8 }
  0x74   : > { %s1068_s9 = scalar_lea.hbm %s1067_s8, 1  ;;  %p1071_p10 = scmp.lt.s32.totalorder %s1067_s8, %s1810_s1 }
  0x75   : > { %p1069_p8 = scmp.ne.s32.totalorder %s1067_s8, %s1068_s9  ;;  %p1072_p13 = scmp.lt.s32.totalorder %s1600_s29, %s1068_s9 }
  0x77   : > { %p1073_p0 = por %p1072_p13, %p1071_p10 }
  0x79   : > { %p1074_p1 = pnand %p1073_p0, %p1069_p8 }
  0x7b   : > { %1077 = shalt.err (!%p1074_p1)  }
  0x7c   : > { %272 = dma.hbm_to_vmem [thread:$0]  %s268_s23, 16, %s270_s24, [#allocation3 + $0x5] }
  0x7d   : > { %s774_s7 = sld [smem:[#allocation5 + $0x7]]  ;;  %s1090_s11 = sshra.s32 %s286_s14, 4  ;;  %s1091_s11 = int_to_ptr.hbm [resolvable:$true] %s1090_s11 }
  0x7e   : > { %s1092_s5 = scalar_lea.hbm %s1091_s11, 1  ;;  %p1095_p3 = scmp.lt.s32.totalorder %s1091_s11, %s1810_s1 }
  0x7f   : > { %p1093_p2 = scmp.ne.s32.totalorder %s1091_s11, %s1092_s5  ;;  %p1096_p4 = scmp.lt.s32.totalorder %s1600_s29, %s1092_s5 }
  0x81   : > { %p1097_p5 = por %p1096_p4, %p1095_p3 }
  0x83   : > { %p1098_p6 = pnand %p1097_p5, %p1093_p2 }
  0x85   : > { %1101 = shalt.err (!%p1098_p6)  }
  0x86   : > { %290 = dma.hbm_to_vmem [thread:$0]  %s286_s14, 16, %s288_s2, [#allocation3 + $0x6] }
  0x87   : > { %s775_s15 = sld [smem:[#allocation5 + $0x8]]  ;;  %s1458_s25 = smov [#allocation2 + $0x7]  }
  0x88   : > { %s305_s18 = sshll.u32 %s1458_s25, 4  ;;  %s1459_s24 = smov [#allocation2 + $0x8]   ;;  %s306_s18 = int_to_ptr.vmem [resolvable:$true] %s305_s18 }
  0x89   : > { %s1659_s23 = sshll.u32 %s1459_s24, 4  ;;  %s1662_s10 = sld [smem:[#allocation5 + $0x9]]  ;;  %s324_s23 = int_to_ptr.vmem [resolvable:$true] %s1659_s23 }
  0x8a   : > { %s293_s8 = scalar_lea.hbm %s1810_s1, %s774_s7  ;;  %s1460_s13 = smov [#allocation2 + $0x9]  }
  0x8b   : > { %s303_s9 = sshll.u32 %s293_s8, 4  ;;  %s1667_s12 = sshll.u32 %s1460_s13, 4  ;;  %s304_s9 = int_to_ptr.hbm [resolvable:$true] %s303_s9  ;;  %s342_s12 = int_to_ptr.vmem [resolvable:$true] %s1667_s12 }
  0x8c   : > { %s1114_s5 = sshra.s32 %s304_s9, 4  ;;  %s1115_s5 = int_to_ptr.hbm [resolvable:$true] %s1114_s5 }
  0x8d   : > { %s311_s11 = scalar_lea.hbm %s1810_s1, %s775_s15  ;;  %s1116_s20 = scalar_lea.hbm %s1115_s5, 1 }
  0x8e   : > { %p1117_p7 = scmp.ne.s32.totalorder %s1115_s5, %s1116_s20  ;;  %p1119_p8 = scmp.lt.s32.totalorder %s1115_s5, %s1810_s1 }
  0x8f   : > { %p1120_p10 = scmp.lt.s32.totalorder %s1600_s29, %s1116_s20 }
  0x91   : > { %p1121_p13 = por %p1120_p10, %p1119_p8 }
  0x93   : > { %p1122_p0 = pnand %p1121_p13, %p1117_p7 }
  0x95   : > { %1125 = shalt.err (!%p1122_p0)  }
  0x96   : > { %308 = dma.hbm_to_vmem [thread:$0]  %s304_s9, 16, %s306_s18, [#allocation3 + $0x7] }
  0x97   : > { %s321_s7 = sshll.u32 %s311_s11, 4  ;;  %s329_s6 = scalar_lea.hbm %s1810_s1, %s1662_s10  ;;  %s322_s7 = int_to_ptr.hbm [resolvable:$true] %s321_s7 }
  0x98   : > { %s1138_s27 = sshra.s32 %s322_s7, 4  ;;  %s1139_s27 = int_to_ptr.hbm [resolvable:$true] %s1138_s27 }
  0x99   : > { %s1140_s8 = scalar_lea.hbm %s1139_s27, 1  ;;  %p1143_p2 = scmp.lt.s32.totalorder %s1139_s27, %s1810_s1 }
  0x9a   : > { %p1141_p1 = scmp.ne.s32.totalorder %s1139_s27, %s1140_s8  ;;  %p1144_p3 = scmp.lt.s32.totalorder %s1600_s29, %s1140_s8 }
  0x9c   : > { %p1145_p4 = por %p1144_p3, %p1143_p2 }
  0x9e   : > { %p1146_p5 = pnand %p1145_p4, %p1141_p1 }
  0xa0   : > { %1149 = shalt.err (!%p1146_p5)  }
  0xa1   : > { %326 = dma.hbm_to_vmem [thread:$0]  %s322_s7, 16, %s324_s23, [#allocation3 + $0x8] }
  0xa2   : > { %s339_s18 = sshll.u32 %s329_s6, 4  ;;  %s777_s9 = sld [smem:[#allocation5 + $0xa]]  ;;  %s340_s18 = int_to_ptr.hbm [resolvable:$true] %s339_s18 }
  0xa3   : > { %s1162_s10 = sshra.s32 %s340_s18, 4  ;;  %s1163_s10 = int_to_ptr.hbm [resolvable:$true] %s1162_s10 }
  0xa4   : > { %s1164_s14 = scalar_lea.hbm %s1163_s10, 1  ;;  %p1167_p7 = scmp.lt.s32.totalorder %s1163_s10, %s1810_s1 }
  0xa5   : > { %p1165_p6 = scmp.ne.s32.totalorder %s1163_s10, %s1164_s14  ;;  %p1168_p8 = scmp.lt.s32.totalorder %s1600_s29, %s1164_s14 }
  0xa7   : > { %p1169_p10 = por %p1168_p8, %p1167_p7 }
  0xa9   : > { %p1170_p13 = pnand %p1169_p10, %p1165_p6 }
  0xab   : > { %1173 = shalt.err (!%p1170_p13)  }
  0xac   : > { %344 = dma.hbm_to_vmem [thread:$0]  %s340_s18, 16, %s342_s12, [#allocation3 + $0x9] }
  0xad   : > { %s1461_s20 = smov [#allocation2 + $0xa]   ;;  %s778_s25 = sld [smem:[#allocation5 + $0xb]] }
  0xae   : > { %s359_s22 = sshll.u32 %s1461_s20, 4  ;;  %s1462_s23 = smov [#allocation2 + $0xb]   ;;  %s360_s22 = int_to_ptr.vmem [resolvable:$true] %s359_s22 }
  0xaf   : > { %s1691_s7 = sshll.u32 %s1462_s23, 4  ;;  %s779_s15 = sld [smem:[#allocation5 + $0xc]]  ;;  %s378_s7 = int_to_ptr.vmem [resolvable:$true] %s1691_s7 }
  0xb0   : > { %s347_s27 = scalar_lea.hbm %s1810_s1, %s777_s9  ;;  %s1463_s13 = smov [#allocation2 + $0xc]  }
  0xb1   : > { %s357_s8 = sshll.u32 %s347_s27, 4  ;;  %s1697_s2 = sshll.u32 %s1463_s13, 4  ;;  %s358_s8 = int_to_ptr.hbm [resolvable:$true] %s357_s8  ;;  %s396_s2 = int_to_ptr.vmem [resolvable:$true] %s1697_s2 }
  0xb2   : > { %s1186_s12 = sshra.s32 %s358_s8, 4  ;;  %s1187_s12 = int_to_ptr.hbm [resolvable:$true] %s1186_s12 }
  0xb3   : > { %s1188_s18 = scalar_lea.hbm %s1187_s12, 1  ;;  %p1191_p1 = scmp.lt.s32.totalorder %s1187_s12, %s1810_s1 }
  0xb4   : > { %p1189_p0 = scmp.ne.s32.totalorder %s1187_s12, %s1188_s18  ;;  %p1192_p2 = scmp.lt.s32.totalorder %s1600_s29, %s1188_s18 }
  0xb6   : > { %p1193_p3 = por %p1192_p2, %p1191_p1 }
  0xb8   : > { %p1194_p4 = pnand %p1193_p3, %p1189_p0 }
  0xba   : > { %1197 = shalt.err (!%p1194_p4)  }
  0xbb   : > { %362 = dma.hbm_to_vmem [thread:$0]  %s358_s8, 16, %s360_s22, [#allocation3 + $0xa] }
  0xbc   : > { %s365_s5 = scalar_lea.hbm %s1810_s1, %s778_s25  ;;  %s383_s6 = scalar_lea.hbm %s1810_s1, %s779_s15 }
  0xbd   : > { %s375_s20 = sshll.u32 %s365_s5, 4  ;;  %s393_s27 = sshll.u32 %s383_s6, 4  ;;  %s376_s20 = int_to_ptr.hbm [resolvable:$true] %s375_s20  ;;  %s394_s27 = int_to_ptr.hbm [resolvable:$true] %s393_s27 }
  0xbe   : > { %s1210_s13 = sshra.s32 %s376_s20, 4  ;;  %s1211_s13 = int_to_ptr.hbm [resolvable:$true] %s1210_s13 }
  0xbf   : > { %s1212_s12 = scalar_lea.hbm %s1211_s13, 1  ;;  %p1215_p6 = scmp.lt.s32.totalorder %s1211_s13, %s1810_s1 }
  0xc0   : > { %p1213_p5 = scmp.ne.s32.totalorder %s1211_s13, %s1212_s12  ;;  %p1216_p7 = scmp.lt.s32.totalorder %s1600_s29, %s1212_s12 }
  0xc2   : > { %p1217_p8 = por %p1216_p7, %p1215_p6 }
  0xc4   : > { %p1218_p10 = pnand %p1217_p8, %p1213_p5 }
  0xc6   : > { %1221 = shalt.err (!%p1218_p10)  }
  0xc7   : > { %380 = dma.hbm_to_vmem [thread:$0]  %s376_s20, 16, %s378_s7, [#allocation3 + $0xb] }
  0xc8   : > { %s780_s25 = sld [smem:[#allocation5 + $0xd]]  ;;  %s1234_s15 = sshra.s32 %s394_s27, 4  ;;  %s1235_s15 = int_to_ptr.hbm [resolvable:$true] %s1234_s15 }
  0xc9   : > { %s1236_s8 = scalar_lea.hbm %s1235_s15, 1  ;;  %p1239_p0 = scmp.lt.s32.totalorder %s1235_s15, %s1810_s1 }
  0xca   : > { %p1237_p13 = scmp.ne.s32.totalorder %s1235_s15, %s1236_s8  ;;  %p1240_p1 = scmp.lt.s32.totalorder %s1600_s29, %s1236_s8 }
  0xcc   : > { %p1241_p2 = por %p1240_p1, %p1239_p0 }
  0xce   : > { %p1242_p3 = pnand %p1241_p2, %p1237_p13 }
  0xd0   : > { %1245 = shalt.err (!%p1242_p3)  }
  0xd1   : > { %398 = dma.hbm_to_vmem [thread:$0]  %s394_s27, 16, %s396_s2, [#allocation3 + $0xc] }
  0xd2   : > { %s781_s9 = sld [smem:[#allocation5 + $0xe]]  ;;  %s1464_s11 = smov [#allocation2 + $0xd]  }
  0xd3   : > { %s413_s5 = sshll.u32 %s1464_s11, 4  ;;  %s1465_s7 = smov [#allocation2 + $0xe]   ;;  %s414_s5 = int_to_ptr.vmem [resolvable:$true] %s413_s5 }
  0xd4   : > { %s1720_s20 = sshll.u32 %s1465_s7, 4  ;;  %s1723_s23 = sld [smem:[#allocation5 + $0xf]]  ;;  %s432_s20 = int_to_ptr.vmem [resolvable:$true] %s1720_s20 }
  0xd5   : > { %s401_s13 = scalar_lea.hbm %s1810_s1, %s780_s25  ;;  %s1466_s18 = smov [#allocation2 + $0xf]  }
  0xd6   : > { %s411_s12 = sshll.u32 %s401_s13, 4  ;;  %s1728_s22 = sshll.u32 %s1466_s18, 4  ;;  %s412_s12 = int_to_ptr.hbm [resolvable:$true] %s411_s12  ;;  %s450_s22 = int_to_ptr.vmem [resolvable:$true] %s1728_s22 }
  0xd7   : > { %s1258_s8 = sshra.s32 %s412_s12, 4  ;;  %s1259_s8 = int_to_ptr.hbm [resolvable:$true] %s1258_s8 }
  0xd8   : > { %s419_s15 = scalar_lea.hbm %s1810_s1, %s781_s9  ;;  %s1260_s10 = scalar_lea.hbm %s1259_s8, 1 }
  0xd9   : > { %p1261_p4 = scmp.ne.s32.totalorder %s1259_s8, %s1260_s10  ;;  %p1263_p5 = scmp.lt.s32.totalorder %s1259_s8, %s1810_s1 }
  0xda   : > { %p1264_p6 = scmp.lt.s32.totalorder %s1600_s29, %s1260_s10 }
  0xdc   : > { %p1265_p7 = por %p1264_p6, %p1263_p5 }
  0xde   : > { %p1266_p8 = pnand %p1265_p7, %p1261_p4 }
  0xe0   : > { %1269 = shalt.err (!%p1266_p8)  }
  0xe1   : > { %416 = dma.hbm_to_vmem [thread:$0]  %s412_s12, 16, %s414_s5, [#allocation3 + $0xd] }
  0xe2   : > { %s429_s25 = sshll.u32 %s419_s15, 4  ;;  %s437_s24 = scalar_lea.hbm %s1810_s1, %s1723_s23  ;;  %s430_s25 = int_to_ptr.hbm [resolvable:$true] %s429_s25 }
  0xe3   : > { %s1282_s6 = sshra.s32 %s430_s25, 4  ;;  %s1283_s6 = int_to_ptr.hbm [resolvable:$true] %s1282_s6 }
  0xe4   : > { %s1284_s13 = scalar_lea.hbm %s1283_s6, 1  ;;  %p1287_p13 = scmp.lt.s32.totalorder %s1283_s6, %s1810_s1 }
  0xe5   : > { %p1285_p10 = scmp.ne.s32.totalorder %s1283_s6, %s1284_s13  ;;  %p1288_p0 = scmp.lt.s32.totalorder %s1600_s29, %s1284_s13 }
  0xe7   : > { %p1289_p1 = por %p1288_p0, %p1287_p13 }
  0xe9   : > { %p1290_p2 = pnand %p1289_p1, %p1285_p10 }
  0xeb   : > { %1293 = shalt.err (!%p1290_p2)  }
  0xec   : > { %434 = dma.hbm_to_vmem [thread:$0]  %s430_s25, 16, %s432_s20, [#allocation3 + $0xe] }
  0xed   : > { %s447_s5 = sshll.u32 %s437_s24, 4  ;;  %s448_s5 = int_to_ptr.hbm [resolvable:$true] %s447_s5 }
  0xee   : > { %s1306_s12 = sshra.s32 %s448_s5, 4  ;;  %s1307_s12 = int_to_ptr.hbm [resolvable:$true] %s1306_s12 }
  0xef   : > { %s1308_s23 = scalar_lea.hbm %s1307_s12, 1  ;;  %p1311_p4 = scmp.lt.s32.totalorder %s1307_s12, %s1810_s1 }
  0xf0   : > { %p1309_p3 = scmp.ne.s32.totalorder %s1307_s12, %s1308_s23  ;;  %p1312_p5 = scmp.lt.s32.totalorder %s1600_s29, %s1308_s23 }
  0xf2   : > { %p1313_p6 = por %p1312_p5, %p1311_p4 }
  0xf4   : > { %p1314_p7 = pnand %p1313_p6, %p1309_p3 }
  0xf6   : > { %1317 = shalt.err (!%p1314_p7)  }
  0xf7   : > { %452 = dma.hbm_to_vmem [thread:$0]  %s448_s5, 16, %s450_s22, [#allocation3 + $0xf] }
  0xf8   : > { %1388 = dma.done.wait [#allocation3], 16 }
  0xf9   : > { %1389 = vsyncadd [#allocation3], 4294967280 }
  0xfa   : > { %1390 = dma.done.wait [#allocation3 + $0x1], 16 }
  0xfb   : > { %1391 = vsyncadd [#allocation3 + $0x1], 4294967280 }
  0xfc   : > { %1392 = dma.done.wait [#allocation3 + $0x2], 16 }
  0xfd   : > { %1393 = vsyncadd [#allocation3 + $0x2], 4294967280 }
  0xfe   : > { %1394 = dma.done.wait [#allocation3 + $0x3], 16 }
  0xff   : > { %1395 = vsyncadd [#allocation3 + $0x3], 4294967280 }
 0x100   : > { %1396 = dma.done.wait [#allocation3 + $0x4], 16 }
 0x101   : > { %1397 = vsyncadd [#allocation3 + $0x4], 4294967280 }
 0x102   : > { %1398 = dma.done.wait [#allocation3 + $0x5], 16 }
 0x103   : > { %1399 = vsyncadd [#allocation3 + $0x5], 4294967280 }
 0x104   : > { %1400 = dma.done.wait [#allocation3 + $0x6], 16 }
 0x105   : > { %1401 = vsyncadd [#allocation3 + $0x6], 4294967280 }
 0x106   : > { %1402 = dma.done.wait [#allocation3 + $0x7], 16 }
 0x107   : > { %1403 = vsyncadd [#allocation3 + $0x7], 4294967280 }
 0x108   : > { %1404 = dma.done.wait [#allocation3 + $0x8], 16 }
 0x109   : > { %1405 = vsyncadd [#allocation3 + $0x8], 4294967280 }
 0x10a   : > { %1406 = dma.done.wait [#allocation3 + $0x9], 16 }
 0x10b   : > { %1407 = vsyncadd [#allocation3 + $0x9], 4294967280 }
 0x10c   : > { %1408 = dma.done.wait [#allocation3 + $0xa], 16 }
 0x10d   : > { %1409 = vsyncadd [#allocation3 + $0xa], 4294967280 }
 0x10e   : > { %1410 = dma.done.wait [#allocation3 + $0xb], 16 }
 0x10f   : > { %1411 = vsyncadd [#allocation3 + $0xb], 4294967280 }
 0x110   : > { %1412 = dma.done.wait [#allocation3 + $0xc], 16 }
 0x111   : > { %1413 = vsyncadd [#allocation3 + $0xc], 4294967280 }
 0x112   : > { %1414 = dma.done.wait [#allocation3 + $0xd], 16 }
 0x113   : > { %1415 = vsyncadd [#allocation3 + $0xd], 4294967280 }
 0x114   : > { %1416 = dma.done.wait [#allocation3 + $0xe], 16 }
 0x115   : > { %1417 = vsyncadd [#allocation3 + $0xe], 4294967280 }
 0x116   : > { %1418 = dma.done.wait [#allocation3 + $0xf], 16 }
 0x117   : > { %1419 = vsyncadd [#allocation3 + $0xf], 4294967280 }
 0x118 PF: > { %v503_v0 = vld [vmem:[%s1571_s26 + $0x78] sm:$0xff]  ;;  %v502_v1 = vld [vmem:[%s1571_s26 + $0x70] sm:$0xff]  ;;  %v501_v2 = vld [vmem:[%s1571_s26 + $0x68] sm:$0xff]  ;;  %s784_s29 = sshll.u32 %s1438_s19, 3  ;;  %s544_s10 = sshll.u32 %s1578_s4, 4  ;;  %s545_s10 = int_to_ptr.vmem [resolvable:$true] %s544_s10 }
 0x119   : > { %504 = vmatpush.xpose.msra.mxu0 %v503_v0  ;;  %804 = vmatpush.xpose.msra.mxu1 %v503_v0  ;;  %v500_v3 = vld [vmem:[%s1571_s26 + $0x60] sm:$0xff]  ;;  %v499_v4 = vld [vmem:[%s1571_s26 + $0x58] sm:$0xff]  ;;  %v498_v5 = vld [vmem:[%s1571_s26 + $0x50] sm:$0xff]  ;;  %s543_s8 = scalar_lea.hbm %s1812_s3, %s784_s29  ;;  %s1350_s7 = scalar_lea.hbm %s1812_s3, 32 }
 0x11a   : > { %v497_v6 = vld [vmem:[%s1571_s26 + $0x48] sm:$0xff]  ;;  %v496_v7 = vld [vmem:[%s1571_s26 + $0x40] sm:$0xff]  ;;  %v495_v8 = vld [vmem:[%s1571_s26 + $0x38] sm:$0xff]  ;;  %s546_s14 = sshll.u32 %s543_s8, 4  ;;  %s547_s14 = int_to_ptr.hbm [resolvable:$true] %s546_s14 }
 0x11b   : > { %v494_v9 = vld [vmem:[%s1571_s26 + $0x30] sm:$0xff]  ;;  %v493_v10 = vld [vmem:[%s1571_s26 + $0x28] sm:$0xff]  ;;  %v492_v11 = vld [vmem:[%s1571_s26 + $0x20] sm:$0xff]  ;;  %s1344_s11 = sshra.s32 %s547_s14, 4  ;;  %s1345_s11 = int_to_ptr.hbm [resolvable:$true] %s1344_s11 }
 0x11c   : > { %v491_v12 = vld [vmem:[%s1571_s26 + $0x18] sm:$0xff]  ;;  %v490_v13 = vld [vmem:[%s1571_s26 + $0x10] sm:$0xff]  ;;  %v489_v14 = vld [vmem:[%s1571_s26 + $0x8] sm:$0xff]  ;;  %s1346_s25 = scalar_lea.hbm %s1345_s11, 16  ;;  %p1351_p0 = scmp.lt.s32.totalorder %s1345_s11, %s1812_s3 }
 0x11d   : > { %505 = vmatpush.xpose.msra.mxu0 %v502_v1  ;;  %805 = vmatpush.xpose.msra.mxu1 %v502_v1  ;;  %v488_v15 = vld [vmem:[%s1571_s26] sm:$0xff]  ;;  %v486_v16 = vld [vmem:[#allocation2] sm:$0xff]  ;;  %v487_v17 = vld [vmem:[#allocation2 + $0x8] sm:$0xff]  ;;  %s530_s26 = scalar_lea.sflag [#allocation8], %s1567_s21  ;;  %p1347_p8 = scmp.ne.s32.totalorder %s1345_s11, %s1346_s25 }
 0x11e   : > { %p1352_p1 = scmp.lt.s32.totalorder %s1350_s7, %s1346_s25 }
 0x11f   : > { %p1348_p10 = pnand %p1347_p8, %p1544_p9 }
 0x120   : > { %p1353_p2 = por %p1352_p1, %p1351_p0 }
 0x121   : > { %506 = vmatpush.xpose.msra.mxu0 %v501_v2  ;;  %806 = vmatpush.xpose.msra.mxu1 %v501_v2  ;;  %p1349_p13 = pneg %p1348_p10 }
 0x123   : > { %p1354_p3 = pnand %p1353_p2, %p1349_p13 }
 0x125   : > { %507 = vmatpush.xpose.msra.mxu0 %v500_v3  ;;  %807 = vmatpush.xpose.msra.mxu1 %v500_v3 }
 0x129   : > { %508 = vmatpush.xpose.msra.mxu0 %v499_v4  ;;  %808 = vmatpush.xpose.msra.mxu1 %v499_v4 }
 0x12d   : > { %509 = vmatpush.xpose.msra.mxu0 %v498_v5  ;;  %809 = vmatpush.xpose.msra.mxu1 %v498_v5 }
 0x131   : > { %510 = vmatpush.xpose.msra.mxu0 %v497_v6  ;;  %810 = vmatpush.xpose.msra.mxu1 %v497_v6 }
 0x135   : > { %511 = vmatpush.xpose.msra.mxu0 %v496_v7  ;;  %811 = vmatpush.xpose.msra.mxu1 %v496_v7 }
 0x139   : > { %512 = vmatpush.xpose.msra.mxu0 %v495_v8  ;;  %812 = vmatpush.xpose.msra.mxu1 %v495_v8 }
 0x13d   : > { %513 = vmatpush.xpose.msra.mxu0 %v494_v9  ;;  %813 = vmatpush.xpose.msra.mxu1 %v494_v9 }
 0x141   : > { %514 = vmatpush.xpose.msra.mxu0 %v493_v10  ;;  %814 = vmatpush.xpose.msra.mxu1 %v493_v10 }
 0x145   : > { %515 = vmatpush.xpose.msra.mxu0 %v492_v11  ;;  %815 = vmatpush.xpose.msra.mxu1 %v492_v11 }
 0x149   : > { %516 = vmatpush.xpose.msra.mxu0 %v491_v12  ;;  %816 = vmatpush.xpose.msra.mxu1 %v491_v12 }
 0x14d   : > { %517 = vmatpush.xpose.msra.mxu0 %v490_v13  ;;  %817 = vmatpush.xpose.msra.mxu1 %v490_v13 }
 0x151   : > { %518 = vmatpush.xpose.msra.mxu0 %v489_v14  ;;  %818 = vmatpush.xpose.msra.mxu1 %v489_v14 }
 0x155   : > { %519 = vmatpush.xpose.msra.mxu0 %v488_v15  ;;  %819 = vmatpush.xpose.msra.mxu1 %v488_v15 }
 0x158   : > { %520 = vmatmul.f32.vlgmr.msra.gmra.mxu0 %v486_v16  ;;  %523 = vmatmul.f32.vlgmr.msra.gmra.mxu1 %v487_v17 }
 0x1d5   : > { %v521_v18 = vpop.f32.mrf.mxu0  ;;  %v524_v19 = vpop.f32.mrf.mxu1 }
 0x1d6   : > { %527 = vst [vmem:[%s1578_s4] sm:$0xff] %v521_v18 }
 0x1d7   : > { %528 = vst [vmem:[%s1578_s4 + $0x8] sm:$0xff] %v524_v19 }
 0x1d8   : > { %1357 = shalt.err (!%p1354_p3)
}
 0x1d9   : > { %s1467_s21 = smov 128   ;;  %s1468_s4 = smov 256  }
 0x1da   : > { %s1469_s13 = smov 8  }
 0x1db   : > { %822 = dma.vmem_to_hbm [thread:$0]  (%p1544_p9), %s545_s10, 256, %s547_s14, %s530_s26, %s1467_s21, %s1468_s4, %s1469_s13  }
 0x1dc PF: > { %s561_s18 = sand.u32 1, %s1426_s16   ;;  %p829_p4 = pnand %p760_p12, %p1551_p11 }
 0x1dd   : > { %s562_s2 = scalar_lea.sflag [#allocation8], %s561_s18 }
 0x1de   : > { %p830_p5 = pneg %p829_p4 }
 0x1e0   : > { %1421 = dma.done.wait (%p830_p5), %s562_s2, 256  }
 0x1e1   : > { %1423 = vsyncadd (%p830_p5), %s562_s2, 4294967040  ;;  %s27_s0 = sadd.s32 1, %s1446_s0   ;;  %s1830_s5 = sld [smem:[#allocation63_spill]] }
 0x1e2   : > { %p24_p6 = scmp.ge.s32.totalorder %s27_s0, 4   ;;  %s1831_s18 = sld [smem:[#allocation66_spill]] }
 0x1e3   : > { %s1832_s19 = sld [smem:[#allocation64_spill]]  ;;  %s1834_s16 = smov %s1430_s17 }
 0x1e4   : > { %s1833_s20 = sld [smem:[#allocation65_spill]]  ;;  %26 = sbr.rel (!%p24_p6) target bundleno = 12 (0xc), region = 198 }
 0x1e7   : > { %s1835_s17 = smov %s1830_s5 }
 0x1e9   :  { %568 = vsyncpa [#allocation7], 1 }
 0x1ea   :  { %570 = vsyncpa [#allocation7 + $0x1], 1 }
 0x1eb   :  { %571 = vsyncpa [#allocation8], 1 }
 0x1ec   :  { %573 = vsyncpa [#allocation8 + $0x1], 1 }
 0x1ed   :  { %574 = vsyncmov [#allocation3] }
 0x1f0   :  { %s575_s28 = vpop.sfrf %574 }
 0x1f1   :  { %p787_p9 = scmp.ne.s32.totalorder %s575_s28, 0 }
 0x1f3   :  { %579 = shalt.err (%p787_p9)  }
 0x1f4   :  { %581 = vsyncmov [#allocation3 + $0x1] }
 0x1f7   :  { %s582_s30 = vpop.sfrf %581 }
 0x1f8   :  { %p788_p11 = scmp.ne.s32.totalorder %s582_s30, 0 }
 0x1fa   :  { %586 = shalt.err (%p788_p11)  }
 0x1fb   :  { %588 = vsyncmov [#allocation3 + $0x2] }
 0x1fe   :  { %s589_s12 = vpop.sfrf %588 }
 0x1ff   :  { %p789_p12 = scmp.ne.s32.totalorder %s589_s12, 0 }
 0x201   :  { %593 = shalt.err (%p789_p12)  }
 0x202   :  { %595 = vsyncmov [#allocation3 + $0x3] }
 0x205   :  { %s596_s23 = vpop.sfrf %595 }
 0x206   :  { %p790_p7 = scmp.ne.s32.totalorder %s596_s23, 0 }
 0x208   :  { %600 = shalt.err (%p790_p7)  }
 0x209   :  { %602 = vsyncmov [#allocation3 + $0x4] }
 0x20c   :  { %s603_s1 = vpop.sfrf %602 }
 0x20d   :  { %p791_p8 = scmp.ne.s32.totalorder %s603_s1, 0 }
 0x20f   :  { %607 = shalt.err (%p791_p8)  }
 0x210   :  { %609 = vsyncmov [#allocation3 + $0x5] }
 0x213   :  { %s610_s3 = vpop.sfrf %609 }
 0x214   :  { %p792_p10 = scmp.ne.s32.totalorder %s610_s3, 0 }
 0x216   :  { %614 = shalt.err (%p792_p10)  }
 0x217   :  { %616 = vsyncmov [#allocation3 + $0x6] }
 0x21a   :  { %s617_s16 = vpop.sfrf %616 }
 0x21b   :  { %p793_p13 = scmp.ne.s32.totalorder %s617_s16, 0 }
 0x21d   :  { %621 = shalt.err (%p793_p13)  }
 0x21e   :  { %623 = vsyncmov [#allocation3 + $0x7] }
 0x221   :  { %s624_s17 = vpop.sfrf %623 }
 0x222   :  { %p794_p0 = scmp.ne.s32.totalorder %s624_s17, 0 }
 0x224   :  { %628 = shalt.err (%p794_p0)  }
 0x225   :  { %630 = vsyncmov [#allocation3 + $0x8] }
 0x228   :  { %s631_s0 = vpop.sfrf %630 }
 0x229   :  { %p795_p1 = scmp.ne.s32.totalorder %s631_s0, 0 }
 0x22b   :  { %635 = shalt.err (%p795_p1)  }
 0x22c   :  { %637 = vsyncmov [#allocation3 + $0x9] }
 0x22f   :  { %s638_s27 = vpop.sfrf %637 }
 0x230   :  { %p796_p2 = scmp.ne.s32.totalorder %s638_s27, 0 }
 0x232   :  { %642 = shalt.err (%p796_p2)  }
 0x233   :  { %644 = vsyncmov [#allocation3 + $0xa] }
 0x236   :  { %s645_s15 = vpop.sfrf %644 }
 0x237   :  { %p797_p3 = scmp.ne.s32.totalorder %s645_s15, 0 }
 0x239   :  { %649 = shalt.err (%p797_p3)  }
 0x23a   :  { %651 = vsyncmov [#allocation3 + $0xb] }
 0x23d   :  { %s652_s29 = vpop.sfrf %651 }
 0x23e   :  { %p798_p4 = scmp.ne.s32.totalorder %s652_s29, 0 }
 0x240   :  { %656 = shalt.err (%p798_p4)  }
 0x241   :  { %658 = vsyncmov [#allocation3 + $0xc] }
 0x244   :  { %s659_s20 = vpop.sfrf %658 }
 0x245   :  { %p799_p5 = scmp.ne.s32.totalorder %s659_s20, 0 }
 0x247   :  { %663 = shalt.err (%p799_p5)  }
 0x248   :  { %665 = vsyncmov [#allocation3 + $0xd] }
 0x24b   :  { %s666_s22 = vpop.sfrf %665 }
 0x24c   :  { %p800_p6 = scmp.ne.s32.totalorder %s666_s22, 0 }
 0x24e   :  { %670 = shalt.err (%p800_p6)  }
 0x24f   :  { %672 = vsyncmov [#allocation3 + $0xe] }
 0x252   :  { %s673_s8 = vpop.sfrf %672 }
 0x253   :  { %p801_p9 = scmp.ne.s32.totalorder %s673_s8, 0 }
 0x255   :  { %677 = shalt.err (%p801_p9)  }
 0x256   :  { %679 = vsyncmov [#allocation3 + $0xf] }
 0x259   :  { %s680_s10 = vpop.sfrf %679 }
 0x25a   :  { %p802_p11 = scmp.ne.s32.totalorder %s680_s10, 0 }
 0x25c   :  { %684 = shalt.err (%p802_p11)  }

</bundles_post_ra>
